<compile_context>
chip_gen: v7x
topology: tpu7x:2x2x1
jax: 0.10.0
libtpu: 0.0.40
codegen_flags: <defaults>
</compile_context>

<pallas_src>
import jax
import jax.numpy as jnp
import numpy as np
from jax.experimental import pallas as pl
from jax.experimental.pallas import tpu as pltpu

C_IN = 1
C_OUT = 3
K = 4


def convT_kernel(w_ref, x_ref, o_ref, xp_ref):
    # w_ref : SMEM (C_OUT*K*K,)        un-flipped PyTorch weights, flattened (oc, kh, kw)
    # x_ref : VMEM (bb, H, W)          raw (unpadded) input block (bb = batch per step)
    # o_ref : VMEM (bb, C_OUT, Ho, Wo)
    # xp_ref: VMEM (bb, Hp, Wp)        scratch: (K-1)-zero-padded input
    bb, h, w_sp = x_ref.shape
    ho, wo = o_ref.shape[2], o_ref.shape[3]
    hp, wp = xp_ref.shape[1], xp_ref.shape[2]

    # (K-1) zero padding: zero only the four border strips (interior is fully
    # overwritten below).  Done every step -> safe under megacore batch sharding.
    zrow = jnp.zeros((bb, K - 1, wp), xp_ref.dtype)
    xp_ref[:, :K - 1, :] = zrow
    xp_ref[:, K - 1 + h:, :] = zrow
    zcol = jnp.zeros((bb, hp, K - 1), xp_ref.dtype)
    xp_ref[:, :, :K - 1] = zcol
    xp_ref[:, :, K - 1 + w_sp:] = zcol
    xp_ref[:, K - 1:K - 1 + h, K - 1:K - 1 + w_sp] = x_ref[...]
    xp = xp_ref[...]                                   # (bb, Hp, Wp), a few vregs

    # Tap loop outermost; kh sublane shift hoisted out of the kw loop.  Each slab
    # is shared by all 3 output channels via a scalar coefficient read from SMEM
    # (the kernel flip is a compile-time index into the flat weight array).
    accs = [jnp.zeros((bb, ho, wo), jnp.float32) for _ in range(C_OUT)]
    for kh in range(K):
        row = xp[:, kh:kh + ho, :]                     # sublane shift, once per kh
        for kw in range(K):
            slab = row[:, :, kw:kw + wo]               # lane shift
            for oc in range(C_OUT):
                scale = w_ref[oc * K * K + (K - 1 - kh) * K + (K - 1 - kw)]
                accs[oc] = accs[oc] + slab * scale

    for oc in range(C_OUT):
        o_ref[:, oc, :, :] = accs[oc].astype(o_ref.dtype)


def conv_transpose2d(x, weight, *, num_blocks=1):
    """x: (N, 1, H, W) float32, weight: (C_IN, C_OUT, K, K) (PyTorch ConvTranspose2d layout).

    num_blocks=1 -> whole batch in one grid step (best on single-TC v5e/v6e).
    num_blocks=2 -> one fat block per TensorCore on v7x megacore.
    """
    n, cin, h, w_sp = x.shape
    assert cin == C_IN and weight.shape == (C_IN, C_OUT, K, K)
    num_blocks = max(1, min(int(num_blocks), n))
    assert n % num_blocks == 0, "batch must divide evenly into blocks"
    bb = n // num_blocks
    ho, wo = h + K - 1, w_sp + K - 1
    hp, wp = h + 2 * (K - 1), w_sp + 2 * (K - 1)

    x3d = x[:, 0, :, :]                        # (N, H, W) — single input channel squeezed
    w_flat = weight.reshape(C_OUT * K * K)     # flat (oc, kh, kw); flip handled in-kernel

    cost = pl.CostEstimate(
        flops=2 * n * C_OUT * K * K * h * w_sp,
        transcendentals=0,
        bytes_accessed=4 * (n * h * w_sp + n * C_OUT * ho * wo + C_OUT * K * K),
    )

    out = pl.pallas_call(
        convT_kernel,
        out_shape=jax.ShapeDtypeStruct((n, C_OUT, ho, wo), x.dtype),
        grid_spec=pltpu.PrefetchScalarGridSpec(
            num_scalar_prefetch=0,
            grid=(num_blocks,),
            in_specs=[
                # 48 weight scalars, whole array in SMEM (pads to only 256 B).
                pl.BlockSpec(memory_space=pltpu.MemorySpace.SMEM),
                pl.BlockSpec((bb, h, w_sp), lambda b: (b, 0, 0)),
            ],
            out_specs=pl.BlockSpec((bb, C_OUT, ho, wo), lambda b: (b, 0, 0, 0)),
            scratch_shapes=[pltpu.VMEM((bb, hp, wp), jnp.float32)],
        ),
        compiler_params=pltpu.CompilerParams(
            # With num_blocks=2, the two fat blocks shard across the v7x TensorCores.
            dimension_semantics=("parallel",)),
        cost_estimate=cost,
    )(w_flat, x3d)
    return out


def reference(x, weight):
    """Independent reference: correlation of padded input with flipped OIHW kernel via XLA conv."""
    w_oihw = jnp.transpose(weight, (1, 0, 2, 3))[:, :, ::-1, ::-1]
    return jax.lax.conv_general_dilated(
        x, w_oihw,
        window_strides=(1, 1),
        padding=((K - 1, K - 1), (K - 1, K - 1)),
        dimension_numbers=("NCHW", "OIHW", "NCHW"),
    )


if __name__ == "__main__":
    key = jax.random.PRNGKey(0)
    kx, kw = jax.random.split(key)

    # Small shapes consistent with the module: N=2, C_in=1, 16x16 spatial.
    x = jax.random.normal(kx, (2, C_IN, 16, 16), dtype=jnp.float32)
    # Deterministic weight init (PyTorch layout: (in_channels, out_channels, K, K)).
    weight = jax.random.normal(kw, (C_IN, C_OUT, K, K), dtype=jnp.float32) * 0.1

    ref = reference(x, weight)

    # Default path: whole batch in a single grid step.
    out = conv_transpose2d(x, weight)
    out = jax.block_until_ready(out)
    np.testing.assert_allclose(np.asarray(out), np.asarray(ref), rtol=1e-5, atol=1e-5)
    assert out.shape == (2, C_OUT, 19, 19)

    # v7x-style path: two fat blocks (one per TensorCore when megacore is active).
    out2 = conv_transpose2d(x, weight, num_blocks=2)
    out2 = jax.block_until_ready(out2)
    np.testing.assert_allclose(np.asarray(out2), np.asarray(ref), rtol=1e-5, atol=1e-5)

    print("KERNEL_OK")
</pallas_src>

<mosaic_0001>
module attributes {stable_mosaic.version = 11 : i64} {
  func.func @convT_kernel(%arg0: i32, %arg1: memref<48xf32, #tpu.memory_space<smem>>, %arg2: memref<2x16x16xf32, #tpu.memory_space<vmem>>, %arg3: memref<2x3x19x19xf32, #tpu.memory_space<vmem>>, %arg4: memref<2x22x22xf32, #tpu.memory_space<vmem>>) attributes {dimension_semantics = [#tpu.dimension_semantics<parallel>], iteration_bounds = array<i64: 1>, scalar_prefetch = 0 : i64, scratch_operands = 1 : i64, tpu.core_type = #tpu.core_type<tc>, window_params = [{transform_indices = @transform_0, window_bounds = array<i64: 48>}, {transform_indices = @transform_1, window_bounds = array<i64: 2, 16, 16>}, {transform_indices = @transform_2, window_bounds = array<i64: 2, 3, 19, 19>}]} {
    %cst = arith.constant 0.000000e+00 : f32
    %0 = vector.broadcast %cst : f32 to vector<2x3x22xf32>
    %c0 = arith.constant 0 : index
    %c0_0 = arith.constant 0 : index
    %c0_1 = arith.constant 0 : index
    %1 = vector.load %arg4[%c0, %c0_0, %c0_1] : memref<2x22x22xf32, #tpu.memory_space<vmem>>, vector<2x3x22xf32>
    tpu.vector_store %arg4[%c0, %c0_0, %c0_1], %0 {strides = array<i32>} : memref<2x22x22xf32, #tpu.memory_space<vmem>>, vector<2x3x22xf32>,
    %c0_2 = arith.constant 0 : index
    %c19 = arith.constant 19 : index
    %c0_3 = arith.constant 0 : index
    %2 = vector.load %arg4[%c0_2, %c19, %c0_3] : memref<2x22x22xf32, #tpu.memory_space<vmem>>, vector<2x3x22xf32>
    tpu.vector_store %arg4[%c0_2, %c19, %c0_3], %0 {strides = array<i32>} : memref<2x22x22xf32, #tpu.memory_space<vmem>>, vector<2x3x22xf32>,
    %cst_4 = arith.constant 0.000000e+00 : f32
    %3 = vector.broadcast %cst_4 : f32 to vector<2x22x3xf32>
    %c0_5 = arith.constant 0 : index
    %c0_6 = arith.constant 0 : index
    %c0_7 = arith.constant 0 : index
    %4 = vector.load %arg4[%c0_5, %c0_6, %c0_7] : memref<2x22x22xf32, #tpu.memory_space<vmem>>, vector<2x22x3xf32>
    tpu.vector_store %arg4[%c0_5, %c0_6, %c0_7], %3 {strides = array<i32>} : memref<2x22x22xf32, #tpu.memory_space<vmem>>, vector<2x22x3xf32>,
    %c0_8 = arith.constant 0 : index
    %c0_9 = arith.constant 0 : index
    %c19_10 = arith.constant 19 : index
    %5 = vector.load %arg4[%c0_8, %c0_9, %c19_10] : memref<2x22x22xf32, #tpu.memory_space<vmem>>, vector<2x22x3xf32>
    tpu.vector_store %arg4[%c0_8, %c0_9, %c19_10], %3 {strides = array<i32>} : memref<2x22x22xf32, #tpu.memory_space<vmem>>, vector<2x22x3xf32>,
    %c0_11 = arith.constant 0 : index
    %c0_12 = arith.constant 0 : index
    %c0_13 = arith.constant 0 : index
    %6 = vector.load %arg2[%c0_11, %c0_12, %c0_13] : memref<2x16x16xf32, #tpu.memory_space<vmem>>, vector<2x16x16xf32>
    %c0_14 = arith.constant 0 : index
    %c3 = arith.constant 3 : index
    %c3_15 = arith.constant 3 : index
    %7 = vector.load %arg4[%c0_14, %c3, %c3_15] : memref<2x22x22xf32, #tpu.memory_space<vmem>>, vector<2x16x16xf32>
    tpu.vector_store %arg4[%c0_14, %c3, %c3_15], %6 {strides = array<i32>} : memref<2x22x22xf32, #tpu.memory_space<vmem>>, vector<2x16x16xf32>,
    %c0_16 = arith.constant 0 : index
    %c0_17 = arith.constant 0 : index
    %c0_18 = arith.constant 0 : index
    %8 = vector.load %arg4[%c0_16, %c0_17, %c0_18] : memref<2x22x22xf32, #tpu.memory_space<vmem>>, vector<2x22x22xf32>
    %cst_19 = arith.constant 0.000000e+00 : f32
    %9 = vector.broadcast %cst_19 : f32 to vector<2x19x19xf32>
    %cst_20 = arith.constant 0.000000e+00 : f32
    %10 = vector.broadcast %cst_20 : f32 to vector<2x19x19xf32>
    %cst_21 = arith.constant 0.000000e+00 : f32
    %11 = vector.broadcast %cst_21 : f32 to vector<2x19x19xf32>
    %12 = vector.extract_strided_slice %8 {offsets = [0, 0, 0], sizes = [2, 19, 22], strides = [1, 1, 1]} : vector<2x22x22xf32> to vector<2x19x22xf32>
    %13 = vector.extract_strided_slice %12 {offsets = [0, 0, 0], sizes = [2, 19, 19], strides = [1, 1, 1]} : vector<2x19x22xf32> to vector<2x19x19xf32>
    %c15 = arith.constant 15 : index
    %14 = memref.load %arg1[%c15] : memref<48xf32, #tpu.memory_space<smem>>
    %15 = vector.broadcast %14 : f32 to vector<2x19x19xf32>
    %16 = arith.mulf %13, %15 : vector<2x19x19xf32>
    %17 = arith.addf %9, %16 : vector<2x19x19xf32>
    %c31 = arith.constant 31 : index
    %18 = memref.load %arg1[%c31] : memref<48xf32, #tpu.memory_space<smem>>
    %19 = vector.broadcast %18 : f32 to vector<2x19x19xf32>
    %20 = arith.mulf %13, %19 : vector<2x19x19xf32>
    %21 = arith.addf %10, %20 : vector<2x19x19xf32>
    %c47 = arith.constant 47 : index
    %22 = memref.load %arg1[%c47] : memref<48xf32, #tpu.memory_space<smem>>
    %23 = vector.broadcast %22 : f32 to vector<2x19x19xf32>
    %24 = arith.mulf %13, %23 : vector<2x19x19xf32>
    %25 = arith.addf %11, %24 : vector<2x19x19xf32>
    %26 = vector.extract_strided_slice %12 {offsets = [0, 0, 1], sizes = [2, 19, 19], strides = [1, 1, 1]} : vector<2x19x22xf32> to vector<2x19x19xf32>
    %c14 = arith.constant 14 : index
    %27 = memref.load %arg1[%c14] : memref<48xf32, #tpu.memory_space<smem>>
    %28 = vector.broadcast %27 : f32 to vector<2x19x19xf32>
    %29 = arith.mulf %26, %28 : vector<2x19x19xf32>
    %30 = arith.addf %17, %29 : vector<2x19x19xf32>
    %c30 = arith.constant 30 : index
    %31 = memref.load %arg1[%c30] : memref<48xf32, #tpu.memory_space<smem>>
    %32 = vector.broadcast %31 : f32 to vector<2x19x19xf32>
    %33 = arith.mulf %26, %32 : vector<2x19x19xf32>
    %34 = arith.addf %21, %33 : vector<2x19x19xf32>
    %c46 = arith.constant 46 : index
    %35 = memref.load %arg1[%c46] : memref<48xf32, #tpu.memory_space<smem>>
    %36 = vector.broadcast %35 : f32 to vector<2x19x19xf32>
    %37 = arith.mulf %26, %36 : vector<2x19x19xf32>
    %38 = arith.addf %25, %37 : vector<2x19x19xf32>
    %39 = vector.extract_strided_slice %12 {offsets = [0, 0, 2], sizes = [2, 19, 19], strides = [1, 1, 1]} : vector<2x19x22xf32> to vector<2x19x19xf32>
    %c13 = arith.constant 13 : index
    %40 = memref.load %arg1[%c13] : memref<48xf32, #tpu.memory_space<smem>>
    %41 = vector.broadcast %40 : f32 to vector<2x19x19xf32>
    %42 = arith.mulf %39, %41 : vector<2x19x19xf32>
    %43 = arith.addf %30, %42 : vector<2x19x19xf32>
    %c29 = arith.constant 29 : index
    %44 = memref.load %arg1[%c29] : memref<48xf32, #tpu.memory_space<smem>>
    %45 = vector.broadcast %44 : f32 to vector<2x19x19xf32>
    %46 = arith.mulf %39, %45 : vector<2x19x19xf32>
    %47 = arith.addf %34, %46 : vector<2x19x19xf32>
    %c45 = arith.constant 45 : index
    %48 = memref.load %arg1[%c45] : memref<48xf32, #tpu.memory_space<smem>>
    %49 = vector.broadcast %48 : f32 to vector<2x19x19xf32>
    %50 = arith.mulf %39, %49 : vector<2x19x19xf32>
    %51 = arith.addf %38, %50 : vector<2x19x19xf32>
    %52 = vector.extract_strided_slice %12 {offsets = [0, 0, 3], sizes = [2, 19, 19], strides = [1, 1, 1]} : vector<2x19x22xf32> to vector<2x19x19xf32>
    %c12 = arith.constant 12 : index
    %53 = memref.load %arg1[%c12] : memref<48xf32, #tpu.memory_space<smem>>
    %54 = vector.broadcast %53 : f32 to vector<2x19x19xf32>
    %55 = arith.mulf %52, %54 : vector<2x19x19xf32>
    %56 = arith.addf %43, %55 : vector<2x19x19xf32>
    %c28 = arith.constant 28 : index
    %57 = memref.load %arg1[%c28] : memref<48xf32, #tpu.memory_space<smem>>
    %58 = vector.broadcast %57 : f32 to vector<2x19x19xf32>
    %59 = arith.mulf %52, %58 : vector<2x19x19xf32>
    %60 = arith.addf %47, %59 : vector<2x19x19xf32>
    %c44 = arith.constant 44 : index
    %61 = memref.load %arg1[%c44] : memref<48xf32, #tpu.memory_space<smem>>
    %62 = vector.broadcast %61 : f32 to vector<2x19x19xf32>
    %63 = arith.mulf %52, %62 : vector<2x19x19xf32>
    %64 = arith.addf %51, %63 : vector<2x19x19xf32>
    %65 = vector.extract_strided_slice %8 {offsets = [0, 1, 0], sizes = [2, 19, 22], strides = [1, 1, 1]} : vector<2x22x22xf32> to vector<2x19x22xf32>
    %66 = vector.extract_strided_slice %65 {offsets = [0, 0, 0], sizes = [2, 19, 19], strides = [1, 1, 1]} : vector<2x19x22xf32> to vector<2x19x19xf32>
    %c11 = arith.constant 11 : index
    %67 = memref.load %arg1[%c11] : memref<48xf32, #tpu.memory_space<smem>>
    %68 = vector.broadcast %67 : f32 to vector<2x19x19xf32>
    %69 = arith.mulf %66, %68 : vector<2x19x19xf32>
    %70 = arith.addf %56, %69 : vector<2x19x19xf32>
    %c27 = arith.constant 27 : index
    %71 = memref.load %arg1[%c27] : memref<48xf32, #tpu.memory_space<smem>>
    %72 = vector.broadcast %71 : f32 to vector<2x19x19xf32>
    %73 = arith.mulf %66, %72 : vector<2x19x19xf32>
    %74 = arith.addf %60, %73 : vector<2x19x19xf32>
    %c43 = arith.constant 43 : index
    %75 = memref.load %arg1[%c43] : memref<48xf32, #tpu.memory_space<smem>>
    %76 = vector.broadcast %75 : f32 to vector<2x19x19xf32>
    %77 = arith.mulf %66, %76 : vector<2x19x19xf32>
    %78 = arith.addf %64, %77 : vector<2x19x19xf32>
    %79 = vector.extract_strided_slice %65 {offsets = [0, 0, 1], sizes = [2, 19, 19], strides = [1, 1, 1]} : vector<2x19x22xf32> to vector<2x19x19xf32>
    %c10 = arith.constant 10 : index
    %80 = memref.load %arg1[%c10] : memref<48xf32, #tpu.memory_space<smem>>
    %81 = vector.broadcast %80 : f32 to vector<2x19x19xf32>
    %82 = arith.mulf %79, %81 : vector<2x19x19xf32>
    %83 = arith.addf %70, %82 : vector<2x19x19xf32>
    %c26 = arith.constant 26 : index
    %84 = memref.load %arg1[%c26] : memref<48xf32, #tpu.memory_space<smem>>
    %85 = vector.broadcast %84 : f32 to vector<2x19x19xf32>
    %86 = arith.mulf %79, %85 : vector<2x19x19xf32>
    %87 = arith.addf %74, %86 : vector<2x19x19xf32>
    %c42 = arith.constant 42 : index
    %88 = memref.load %arg1[%c42] : memref<48xf32, #tpu.memory_space<smem>>
    %89 = vector.broadcast %88 : f32 to vector<2x19x19xf32>
    %90 = arith.mulf %79, %89 : vector<2x19x19xf32>
    %91 = arith.addf %78, %90 : vector<2x19x19xf32>
    %92 = vector.extract_strided_slice %65 {offsets = [0, 0, 2], sizes = [2, 19, 19], strides = [1, 1, 1]} : vector<2x19x22xf32> to vector<2x19x19xf32>
    %c9 = arith.constant 9 : index
    %93 = memref.load %arg1[%c9] : memref<48xf32, #tpu.memory_space<smem>>
    %94 = vector.broadcast %93 : f32 to vector<2x19x19xf32>
    %95 = arith.mulf %92, %94 : vector<2x19x19xf32>
    %96 = arith.addf %83, %95 : vector<2x19x19xf32>
    %c25 = arith.constant 25 : index
    %97 = memref.load %arg1[%c25] : memref<48xf32, #tpu.memory_space<smem>>
    %98 = vector.broadcast %97 : f32 to vector<2x19x19xf32>
    %99 = arith.mulf %92, %98 : vector<2x19x19xf32>
    %100 = arith.addf %87, %99 : vector<2x19x19xf32>
    %c41 = arith.constant 41 : index
    %101 = memref.load %arg1[%c41] : memref<48xf32, #tpu.memory_space<smem>>
    %102 = vector.broadcast %101 : f32 to vector<2x19x19xf32>
    %103 = arith.mulf %92, %102 : vector<2x19x19xf32>
    %104 = arith.addf %91, %103 : vector<2x19x19xf32>
    %105 = vector.extract_strided_slice %65 {offsets = [0, 0, 3], sizes = [2, 19, 19], strides = [1, 1, 1]} : vector<2x19x22xf32> to vector<2x19x19xf32>
    %c8 = arith.constant 8 : index
    %106 = memref.load %arg1[%c8] : memref<48xf32, #tpu.memory_space<smem>>
    %107 = vector.broadcast %106 : f32 to vector<2x19x19xf32>
    %108 = arith.mulf %105, %107 : vector<2x19x19xf32>
    %109 = arith.addf %96, %108 : vector<2x19x19xf32>
    %c24 = arith.constant 24 : index
    %110 = memref.load %arg1[%c24] : memref<48xf32, #tpu.memory_space<smem>>
    %111 = vector.broadcast %110 : f32 to vector<2x19x19xf32>
    %112 = arith.mulf %105, %111 : vector<2x19x19xf32>
    %113 = arith.addf %100, %112 : vector<2x19x19xf32>
    %c40 = arith.constant 40 : index
    %114 = memref.load %arg1[%c40] : memref<48xf32, #tpu.memory_space<smem>>
    %115 = vector.broadcast %114 : f32 to vector<2x19x19xf32>
    %116 = arith.mulf %105, %115 : vector<2x19x19xf32>
    %117 = arith.addf %104, %116 : vector<2x19x19xf32>
    %118 = vector.extract_strided_slice %8 {offsets = [0, 2, 0], sizes = [2, 19, 22], strides = [1, 1, 1]} : vector<2x22x22xf32> to vector<2x19x22xf32>
    %119 = vector.extract_strided_slice %118 {offsets = [0, 0, 0], sizes = [2, 19, 19], strides = [1, 1, 1]} : vector<2x19x22xf32> to vector<2x19x19xf32>
    %c7 = arith.constant 7 : index
    %120 = memref.load %arg1[%c7] : memref<48xf32, #tpu.memory_space<smem>>
    %121 = vector.broadcast %120 : f32 to vector<2x19x19xf32>
    %122 = arith.mulf %119, %121 : vector<2x19x19xf32>
    %123 = arith.addf %109, %122 : vector<2x19x19xf32>
    %c23 = arith.constant 23 : index
    %124 = memref.load %arg1[%c23] : memref<48xf32, #tpu.memory_space<smem>>
    %125 = vector.broadcast %124 : f32 to vector<2x19x19xf32>
    %126 = arith.mulf %119, %125 : vector<2x19x19xf32>
    %127 = arith.addf %113, %126 : vector<2x19x19xf32>
    %c39 = arith.constant 39 : index
    %128 = memref.load %arg1[%c39] : memref<48xf32, #tpu.memory_space<smem>>
    %129 = vector.broadcast %128 : f32 to vector<2x19x19xf32>
    %130 = arith.mulf %119, %129 : vector<2x19x19xf32>
    %131 = arith.addf %117, %130 : vector<2x19x19xf32>
    %132 = vector.extract_strided_slice %118 {offsets = [0, 0, 1], sizes = [2, 19, 19], strides = [1, 1, 1]} : vector<2x19x22xf32> to vector<2x19x19xf32>
    %c6 = arith.constant 6 : index
    %133 = memref.load %arg1[%c6] : memref<48xf32, #tpu.memory_space<smem>>
    %134 = vector.broadcast %133 : f32 to vector<2x19x19xf32>
    %135 = arith.mulf %132, %134 : vector<2x19x19xf32>
    %136 = arith.addf %123, %135 : vector<2x19x19xf32>
    %c22 = arith.constant 22 : index
    %137 = memref.load %arg1[%c22] : memref<48xf32, #tpu.memory_space<smem>>
    %138 = vector.broadcast %137 : f32 to vector<2x19x19xf32>
    %139 = arith.mulf %132, %138 : vector<2x19x19xf32>
    %140 = arith.addf %127, %139 : vector<2x19x19xf32>
    %c38 = arith.constant 38 : index
    %141 = memref.load %arg1[%c38] : memref<48xf32, #tpu.memory_space<smem>>
    %142 = vector.broadcast %141 : f32 to vector<2x19x19xf32>
    %143 = arith.mulf %132, %142 : vector<2x19x19xf32>
    %144 = arith.addf %131, %143 : vector<2x19x19xf32>
    %145 = vector.extract_strided_slice %118 {offsets = [0, 0, 2], sizes = [2, 19, 19], strides = [1, 1, 1]} : vector<2x19x22xf32> to vector<2x19x19xf32>
    %c5 = arith.constant 5 : index
    %146 = memref.load %arg1[%c5] : memref<48xf32, #tpu.memory_space<smem>>
    %147 = vector.broadcast %146 : f32 to vector<2x19x19xf32>
    %148 = arith.mulf %145, %147 : vector<2x19x19xf32>
    %149 = arith.addf %136, %148 : vector<2x19x19xf32>
    %c21 = arith.constant 21 : index
    %150 = memref.load %arg1[%c21] : memref<48xf32, #tpu.memory_space<smem>>
    %151 = vector.broadcast %150 : f32 to vector<2x19x19xf32>
    %152 = arith.mulf %145, %151 : vector<2x19x19xf32>
    %153 = arith.addf %140, %152 : vector<2x19x19xf32>
    %c37 = arith.constant 37 : index
    %154 = memref.load %arg1[%c37] : memref<48xf32, #tpu.memory_space<smem>>
    %155 = vector.broadcast %154 : f32 to vector<2x19x19xf32>
    %156 = arith.mulf %145, %155 : vector<2x19x19xf32>
    %157 = arith.addf %144, %156 : vector<2x19x19xf32>
    %158 = vector.extract_strided_slice %118 {offsets = [0, 0, 3], sizes = [2, 19, 19], strides = [1, 1, 1]} : vector<2x19x22xf32> to vector<2x19x19xf32>
    %c4 = arith.constant 4 : index
    %159 = memref.load %arg1[%c4] : memref<48xf32, #tpu.memory_space<smem>>
    %160 = vector.broadcast %159 : f32 to vector<2x19x19xf32>
    %161 = arith.mulf %158, %160 : vector<2x19x19xf32>
    %162 = arith.addf %149, %161 : vector<2x19x19xf32>
    %c20 = arith.constant 20 : index
    %163 = memref.load %arg1[%c20] : memref<48xf32, #tpu.memory_space<smem>>
    %164 = vector.broadcast %163 : f32 to vector<2x19x19xf32>
    %165 = arith.mulf %158, %164 : vector<2x19x19xf32>
    %166 = arith.addf %153, %165 : vector<2x19x19xf32>
    %c36 = arith.constant 36 : index
    %167 = memref.load %arg1[%c36] : memref<48xf32, #tpu.memory_space<smem>>
    %168 = vector.broadcast %167 : f32 to vector<2x19x19xf32>
    %169 = arith.mulf %158, %168 : vector<2x19x19xf32>
    %170 = arith.addf %157, %169 : vector<2x19x19xf32>
    %171 = vector.extract_strided_slice %8 {offsets = [0, 3, 0], sizes = [2, 19, 22], strides = [1, 1, 1]} : vector<2x22x22xf32> to vector<2x19x22xf32>
    %172 = vector.extract_strided_slice %171 {offsets = [0, 0, 0], sizes = [2, 19, 19], strides = [1, 1, 1]} : vector<2x19x22xf32> to vector<2x19x19xf32>
    %c3_22 = arith.constant 3 : index
    %173 = memref.load %arg1[%c3_22] : memref<48xf32, #tpu.memory_space<smem>>
    %174 = vector.broadcast %173 : f32 to vector<2x19x19xf32>
    %175 = arith.mulf %172, %174 : vector<2x19x19xf32>
    %176 = arith.addf %162, %175 : vector<2x19x19xf32>
    %c19_23 = arith.constant 19 : index
    %177 = memref.load %arg1[%c19_23] : memref<48xf32, #tpu.memory_space<smem>>
    %178 = vector.broadcast %177 : f32 to vector<2x19x19xf32>
    %179 = arith.mulf %172, %178 : vector<2x19x19xf32>
    %180 = arith.addf %166, %179 : vector<2x19x19xf32>
    %c35 = arith.constant 35 : index
    %181 = memref.load %arg1[%c35] : memref<48xf32, #tpu.memory_space<smem>>
    %182 = vector.broadcast %181 : f32 to vector<2x19x19xf32>
    %183 = arith.mulf %172, %182 : vector<2x19x19xf32>
    %184 = arith.addf %170, %183 : vector<2x19x19xf32>
    %185 = vector.extract_strided_slice %171 {offsets = [0, 0, 1], sizes = [2, 19, 19], strides = [1, 1, 1]} : vector<2x19x22xf32> to vector<2x19x19xf32>
    %c2 = arith.constant 2 : index
    %186 = memref.load %arg1[%c2] : memref<48xf32, #tpu.memory_space<smem>>
    %187 = vector.broadcast %186 : f32 to vector<2x19x19xf32>
    %188 = arith.mulf %185, %187 : vector<2x19x19xf32>
    %189 = arith.addf %176, %188 : vector<2x19x19xf32>
    %c18 = arith.constant 18 : index
    %190 = memref.load %arg1[%c18] : memref<48xf32, #tpu.memory_space<smem>>
    %191 = vector.broadcast %190 : f32 to vector<2x19x19xf32>
    %192 = arith.mulf %185, %191 : vector<2x19x19xf32>
    %193 = arith.addf %180, %192 : vector<2x19x19xf32>
    %c34 = arith.constant 34 : index
    %194 = memref.load %arg1[%c34] : memref<48xf32, #tpu.memory_space<smem>>
    %195 = vector.broadcast %194 : f32 to vector<2x19x19xf32>
    %196 = arith.mulf %185, %195 : vector<2x19x19xf32>
    %197 = arith.addf %184, %196 : vector<2x19x19xf32>
    %198 = vector.extract_strided_slice %171 {offsets = [0, 0, 2], sizes = [2, 19, 19], strides = [1, 1, 1]} : vector<2x19x22xf32> to vector<2x19x19xf32>
    %c1 = arith.constant 1 : index
    %199 = memref.load %arg1[%c1] : memref<48xf32, #tpu.memory_space<smem>>
    %200 = vector.broadcast %199 : f32 to vector<2x19x19xf32>
    %201 = arith.mulf %198, %200 : vector<2x19x19xf32>
    %202 = arith.addf %189, %201 : vector<2x19x19xf32>
    %c17 = arith.constant 17 : index
    %203 = memref.load %arg1[%c17] : memref<48xf32, #tpu.memory_space<smem>>
    %204 = vector.broadcast %203 : f32 to vector<2x19x19xf32>
    %205 = arith.mulf %198, %204 : vector<2x19x19xf32>
    %206 = arith.addf %193, %205 : vector<2x19x19xf32>
    %c33 = arith.constant 33 : index
    %207 = memref.load %arg1[%c33] : memref<48xf32, #tpu.memory_space<smem>>
    %208 = vector.broadcast %207 : f32 to vector<2x19x19xf32>
    %209 = arith.mulf %198, %208 : vector<2x19x19xf32>
    %210 = arith.addf %197, %209 : vector<2x19x19xf32>
    %211 = vector.extract_strided_slice %171 {offsets = [0, 0, 3], sizes = [2, 19, 19], strides = [1, 1, 1]} : vector<2x19x22xf32> to vector<2x19x19xf32>
    %c0_24 = arith.constant 0 : index
    %212 = memref.load %arg1[%c0_24] : memref<48xf32, #tpu.memory_space<smem>>
    %213 = vector.broadcast %212 : f32 to vector<2x19x19xf32>
    %214 = arith.mulf %211, %213 : vector<2x19x19xf32>
    %215 = arith.addf %202, %214 : vector<2x19x19xf32>
    %c16 = arith.constant 16 : index
    %216 = memref.load %arg1[%c16] : memref<48xf32, #tpu.memory_space<smem>>
    %217 = vector.broadcast %216 : f32 to vector<2x19x19xf32>
    %218 = arith.mulf %211, %217 : vector<2x19x19xf32>
    %219 = arith.addf %206, %218 : vector<2x19x19xf32>
    %c32 = arith.constant 32 : index
    %220 = memref.load %arg1[%c32] : memref<48xf32, #tpu.memory_space<smem>>
    %221 = vector.broadcast %220 : f32 to vector<2x19x19xf32>
    %222 = arith.mulf %211, %221 : vector<2x19x19xf32>
    %223 = arith.addf %210, %222 : vector<2x19x19xf32>
    %c0_25 = arith.constant 0 : index
    %c0_26 = arith.constant 0 : index
    %c0_27 = arith.constant 0 : index
    %c0_28 = arith.constant 0 : index
    %224 = vector.load %arg3[%c0_25, %c0_26, %c0_27, %c0_28] : memref<2x3x19x19xf32, #tpu.memory_space<vmem>>, vector<2x1x19x19xf32>
    %225 = vector.shape_cast %224 : vector<2x1x19x19xf32> to vector<2x19x19xf32>
    %226 = vector.shape_cast %215 : vector<2x19x19xf32> to vector<2x1x19x19xf32>
    tpu.vector_store %arg3[%c0_25, %c0_26, %c0_27, %c0_28], %226 {strides = array<i32>} : memref<2x3x19x19xf32, #tpu.memory_space<vmem>>, vector<2x1x19x19xf32>,
    %c0_29 = arith.constant 0 : index
    %c1_30 = arith.constant 1 : index
    %c0_31 = arith.constant 0 : index
    %c0_32 = arith.constant 0 : index
    %227 = vector.load %arg3[%c0_29, %c1_30, %c0_31, %c0_32] : memref<2x3x19x19xf32, #tpu.memory_space<vmem>>, vector<2x1x19x19xf32>
    %228 = vector.shape_cast %227 : vector<2x1x19x19xf32> to vector<2x19x19xf32>
    %229 = vector.shape_cast %219 : vector<2x19x19xf32> to vector<2x1x19x19xf32>
    tpu.vector_store %arg3[%c0_29, %c1_30, %c0_31, %c0_32], %229 {strides = array<i32>} : memref<2x3x19x19xf32, #tpu.memory_space<vmem>>, vector<2x1x19x19xf32>,
    %c0_33 = arith.constant 0 : index
    %c2_34 = arith.constant 2 : index
    %c0_35 = arith.constant 0 : index
    %c0_36 = arith.constant 0 : index
    %230 = vector.load %arg3[%c0_33, %c2_34, %c0_35, %c0_36] : memref<2x3x19x19xf32, #tpu.memory_space<vmem>>, vector<2x1x19x19xf32>
    %231 = vector.shape_cast %230 : vector<2x1x19x19xf32> to vector<2x19x19xf32>
    %232 = vector.shape_cast %223 : vector<2x19x19xf32> to vector<2x1x19x19xf32>
    tpu.vector_store %arg3[%c0_33, %c2_34, %c0_35, %c0_36], %232 {strides = array<i32>} : memref<2x3x19x19xf32, #tpu.memory_space<vmem>>, vector<2x1x19x19xf32>,
    return
  }
  func.func @transform_0(%arg0: i32) -> i32 {
    %c0_i32 = arith.constant 0 : i32
    %c0_i32_0 = arith.constant 0 : i32
    return %c0_i32 : i32
  }
  func.func @transform_1(%arg0: i32) -> (i32, i32, i32) {
    %c0_i32 = arith.constant 0 : i32
    %c0_i32_0 = arith.constant 0 : i32
    %c0_i32_1 = arith.constant 0 : i32
    return %arg0, %c0_i32, %c0_i32_0 : i32, i32, i32
  }
  func.func @transform_2(%arg0: i32) -> (i32, i32, i32, i32) {
    %c0_i32 = arith.constant 0 : i32
    %c0_i32_0 = arith.constant 0 : i32
    %c0_i32_1 = arith.constant 0 : i32
    %c0_i32_2 = arith.constant 0 : i32
    return %arg0, %c0_i32, %c0_i32_0, %c0_i32_1 : i32, i32, i32, i32
  }
}

</mosaic_0001>

<bundles_post_ra>
// kernel: tpu_custom_call.1
= control target key start
LH: loop header
LB: loop body
LE: loop exit
PB: predicated region body
PF: predicated region fallthrough
CT: control target
= control target key end

     0   :  { %7 = vsyncpa [#allocation5], 0  ;;  %s4094_s0 = inlined_call_operand.hbm [shape: f32[48], index: 0, kind: input, shape index: {}]   ;;  %s4095_s1 = inlined_call_operand.hbm [shape: f32[2,16,16], index: 1, kind: input, shape index: {}]   ;;  %s4096_s2 = inlined_call_operand.vmem [shape: f32[2,3,19,19], index: 2, kind: output, shape index: {}]  }
   0x1   :  { %8 = vsyncpa [#allocation4], 0  ;;  %s2203_s11 = scalar_lea.hbm %s4094_s0, 16 }
   0x2   :  { %p2204_p0 = scmp.ne.s32.totalorder %s4094_s0, %s2203_s11  ;;  %p2207_p1 = scmp.lt.u32.totalorder %s2203_s11, %s4094_s0 }
   0x4   :  { %p2209_p2 = pnand %p2207_p1, %p2204_p0 }
   0x6   :  { %2212 = shalt.err (!%p2209_p2)
}
   0x7   :  { %s2239_s16 = smov [#allocation3]   ;;  %s2240_s19 = smov [#allocation6]  }
   0x8   :  { %16 = dma.hbm_to_smem %s4094_s0, 16, %s2239_s16, [#allocation5]  }
   0x9   :  { %s22_s20 = sshll.u32 %s2240_s19, 4  ;;  %s2213_s23 = scalar_lea.hbm %s4095_s1, 512  ;;  %s23_s20 = int_to_ptr.vmem [resolvable:$true] %s22_s20 }
   0xa   :  { %p2214_p3 = scmp.ne.s32.totalorder %s4095_s1, %s2213_s23  ;;  %p2217_p4 = scmp.lt.u32.totalorder %s2213_s23, %s4095_s1 }
   0xc   :  { %p2219_p5 = pnand %p2217_p4, %p2214_p3 }
   0xe   :  { %2222 = shalt.err (!%p2219_p5)
}
   0xf   :  { %s2223_s28 = scalar_lea.vmem %s23_s20, 512  ;;  %p2228_p7 = scmp.lt.s32.totalorder %s23_s20, %s23_s20 }
  0x10   :  { %p2224_p6 = scmp.ne.s32.totalorder %s23_s20, %s2223_s28  ;;  %p2229_p8 = scmp.lt.s32.totalorder %s2223_s28, %s2223_s28 }
  0x12   :  { %p2230_p9 = por %p2229_p8, %p2228_p7 }
  0x14   :  { %p2231_p10 = pnand %p2230_p9, %p2224_p6 }
  0x16   :  { %2234 = shalt.err (!%p2231_p10)
}
  0x17   :  { %s2241_s0 = smov 128   ;;  %s2242_s29 = smov 8  }
  0x18   :  { %28 = dma.hbm_to_vmem [thread:$0]  %s4095_s1, 512, %s23_s20, [#allocation4], %s2241_s0, %s2241_s0, %s2242_s29  }
  0x19   :  { %2235 = dma.done.wait [#allocation5], 16  }
  0x1a   :  { %2236 = vsyncadd [#allocation5], 4294967280 }
  0x1b   :  { %2237 = dma.done.wait [#allocation4], 512  }
  0x1c   :  { %2238 = vsyncadd [#allocation4], 4294966784 }
  0x1d   :  { %35 = sfence }
  0x1e   :  { %v57_v0 = vld [vmem:[#allocation6] sm:$0xff]  ;;  %v59_v1 = vld [vmem:[#allocation6 + $0x10] sm:$0xff]  ;;  %vm36_vm0 = vcmask 174080   ;;  %s2243_s4 = smov 3   ;;  %vm41_vm1 = vcmask 23552   ;;  %vm49_vm2 = vcmask 179352  }
  0x1f   :  { %65 = vrot.lane.b32.xlu0 %v57_v0, %s2243_s4  ;;  %69 = vrot.lane.b32.xlu1 %v59_v1, %s2243_s4  ;;  %vm44_vm3 = vcmask 21504   ;;  %v58_v2 = vld [vmem:[#allocation6 + $0x8] sm:$0xff]  ;;  %v60_v3 = vld [vmem:[#allocation6 + $0x18] sm:$0xff]  ;;  %v2244_v4 = vmov 0.0   ;;  %vm52_vm4 = vcmask 177304   ;;  %vm77_vm5 = vcmask 154648  }
  0x20   :  { %37 = vst.msk [vmem:[#allocation2] sm:$0x7] %vm36_vm0, %v2244_v4  ;;  %38 = vst.msk [vmem:[#allocation2 + $0x18] sm:$0x7] %vm36_vm0, %v2244_v4  ;;  %s2126_s1 = sld [smem:[#allocation3 + $0xe]]  ;;  %s2245_s6 = smov 127  }
  0x21   :  { %43 = vst.msk [vmem:[#allocation2 + $0x8] sm:$0xff] %vm41_vm1, %v2244_v4  ;;  %47 = vst.msk [vmem:[#allocation2 + $0x20] sm:$0xff] %vm41_vm1, %v2244_v4  ;;  %s2127_s5 = sld [smem:[#allocation3 + $0x1e]]  ;;  %s2129_s8 = sld [smem:[#allocation3 + $0xd]]  ;;  %vm486_vm6 = vcmask 1046528   ;;  %vm1027_vm7 = vcmask 1045504  }
  0x22   :  { %39 = vst.msk [vmem:[#allocation2 + $0x13] sm:$0x7] %vm36_vm0, %v2244_v4  ;;  %40 = vst.msk [vmem:[#allocation2 + $0x2b] sm:$0x7] %vm36_vm0, %v2244_v4  ;;  %s2128_s7 = sld [smem:[#allocation3 + $0x2e]]  ;;  %s2130_s9 = sld [smem:[#allocation3 + $0x1d]] }
  0x23   :  { %42 = vst.msk [vmem:[#allocation2] sm:$0xff] %vm41_vm1, %v2244_v4  ;;  %46 = vst.msk [vmem:[#allocation2 + $0x18] sm:$0xff] %vm41_vm1, %v2244_v4  ;;  %67 = vrot.lane.b32.xlu0 %v58_v2, %s2243_s4  ;;  %71 = vrot.lane.b32.xlu1 %v60_v3, %s2243_s4  ;;  %s2246_s10 = smov 126   ;;  %s2131_s11 = sld [smem:[#allocation3 + $0x2d]]  ;;  %vm1568_vm8 = vcmask 1044480   ;;  %vm2095_vm9 = vcmask 154624  }
  0x24   :  { %51 = vst.msk [vmem:[#allocation2 + $0x8] sm:$0xff] %vm49_vm2, %v2244_v4  ;;  %55 = vst.msk [vmem:[#allocation2 + $0x20] sm:$0xff] %vm49_vm2, %v2244_v4  ;;  %s2132_s12 = sld [smem:[#allocation3 + $0xc]]  ;;  %s2247_s14 = smov 125   ;;  %vm2098_vm10 = vcmask 149504  }
  0x25   :  { %45 = vst.msk [vmem:[#allocation2 + $0x10] sm:$0x3f] %vm44_vm3, %v2244_v4  ;;  %48 = vst.msk [vmem:[#allocation2 + $0x28] sm:$0x3f] %vm44_vm3, %v2244_v4  ;;  %s2133_s13 = sld [smem:[#allocation3 + $0x1c]]  ;;  %s2138_s16 = sld [smem:[#allocation3 + $0xa]] }
  0x26   :  { %50 = vst.msk [vmem:[#allocation2] sm:$0xff] %vm49_vm2, %v2244_v4  ;;  %54 = vst.msk [vmem:[#allocation2 + $0x18] sm:$0xff] %vm49_vm2, %v2244_v4  ;;  %v131_v9 = vstv %s2126_s1  ;;  %s2134_s15 = sld [smem:[#allocation3 + $0x2c]]  ;;  %s2139_s17 = sld [smem:[#allocation3 + $0x1a]] }
  0x27   :  { %53 = vst.msk [vmem:[#allocation2 + $0x10] sm:$0x3f] %vm52_vm4, %v2244_v4  ;;  %56 = vst.msk [vmem:[#allocation2 + $0x28] sm:$0x3f] %vm52_vm4, %v2244_v4  ;;  %v169_v21 = vstv %s2127_s5  ;;  %v245_v35 = vstv %s2129_s8  ;;  %s2140_s18 = sld [smem:[#allocation3 + $0x2a]]  ;;  %s2141_s19 = sld [smem:[#allocation3 + $0x9]] }
  0x28   :  { %v207_v28 = vstv %s2128_s7  ;;  %v283_v42 = vstv %s2130_s9  ;;  %s2142_s20 = sld [smem:[#allocation3 + $0x19]]  ;;  %s2144_s22 = sld [smem:[#allocation3 + $0x8]] }
  0x29   :  { %v321_v49 = vstv %s2131_s11  ;;  %s2143_s21 = sld [smem:[#allocation3 + $0x29]]  ;;  %s2145_s23 = sld [smem:[#allocation3 + $0x18]] }
  0x2a   :  { %v359_v56 = vstv %s2132_s12  ;;  %s2146_s24 = sld [smem:[#allocation3 + $0x28]]  ;;  %s2150_s25 = sld [smem:[#allocation3 + $0x6]] }
  0x2b   :  { %v397_v63 = vstv %s2133_s13  ;;  %s2151_s26 = sld [smem:[#allocation3 + $0x16]]  ;;  %s2153_s28 = sld [smem:[#allocation3 + $0x5]] }
  0x2c   :  { %s2152_s27 = sld [smem:[#allocation3 + $0x26]]  ;;  %s2154_s0 = sld [smem:[#allocation3 + $0x15]] }
  0x2d   :  { %s2155_s29 = sld [smem:[#allocation3 + $0x25]]  ;;  %s2156_s30 = sld [smem:[#allocation3 + $0x4]] }
  0x2e   :  { %s2817_s3 = sld [smem:[#allocation3 + $0xf]]  ;;  %s2825_s5 = sld [smem:[#allocation3 + $0xb]] }
  0x2f   :  { %s2821_s4 = sld [smem:[#allocation3 + $0x1f]]  ;;  %s2827_s7 = sld [smem:[#allocation3 + $0x1b]] }
  0x30   :  { %s2823_s1 = sld [smem:[#allocation3 + $0x2f]]  ;;  %s2833_s8 = sld [smem:[#allocation3 + $0x2b]] }
  0x31   :  { %s2837_s9 = sld [smem:[#allocation3 + $0x14]]  ;;  %s2843_s12 = sld [smem:[#allocation3 + $0x2]] }
  0x32   :  { %s2841_s11 = sld [smem:[#allocation3 + $0x24]]  ;;  %s2846_s13 = sld [smem:[#allocation3 + $0x7]] }
  0x91   :  { %v66_v5 = vpop.permute.xlu0 %65  ;;  %v70_v6 = vpop.permute.xlu1 %69 }
  0x92   :  { %78 = vst.msk [vmem:[#allocation2 + $0x3] sm:$0xff] %vm77_vm5, %v66_v5  ;;  %80 = vst.msk [vmem:[#allocation2 + $0x1b] sm:$0xff] %vm77_vm5, %v70_v6  ;;  %v435_v6 = vstv %s2134_s15  ;;  %s2848_s15 = sld [smem:[#allocation3 + $0x12]] }
  0x95   :  { %v68_v7 = vpop.permute.xlu0 %67  ;;  %v72_v8 = vpop.permute.xlu1 %71 }
  0x96   :  { %79 = vst.msk [vmem:[#allocation2 + $0xb] sm:$0xff] %vm77_vm5, %v68_v7  ;;  %81 = vst.msk [vmem:[#allocation2 + $0x23] sm:$0xff] %vm77_vm5, %v72_v8 }
  0x99   :  { %v2293_v10 = vld [vmem:[#allocation2] sm:$0xff]  ;;  %v2296_v12 = vld [vmem:[#allocation2 + $0x18] sm:$0xff] }
  0x9a   :  { %v132_v11 = vmul.f32 %v131_v9, %v2293_v10  ;;  %v135_v18 = vmul.f32 %v131_v9, %v2296_v12  ;;  %v170_v23 = vmul.f32 %v169_v21, %v2293_v10  ;;  %v173_v26 = vmul.f32 %v169_v21, %v2296_v12 }
  0x9b   :  { %v208_v30 = vmul.f32 %v207_v28, %v2293_v10  ;;  %v211_v33 = vmul.f32 %v207_v28, %v2296_v12  ;;  %v246_v37 = vmul.f32 %v245_v35, %v2293_v10  ;;  %v249_v40 = vmul.f32 %v245_v35, %v2296_v12 }
  0x9c   :  { %144 = vrot.lane.b32.xlu0 %v132_v11, %s2245_s6  ;;  %v284_v44 = vmul.f32 %v283_v42, %v2293_v10  ;;  %v287_v47 = vmul.f32 %v283_v42, %v2296_v12  ;;  %v322_v51 = vmul.f32 %v321_v49, %v2293_v10  ;;  %v325_v54 = vmul.f32 %v321_v49, %v2296_v12 }
  0x9d   :  { %v2299_v13 = vld [vmem:[#allocation2 + $0x8] sm:$0xff]  ;;  %v2301_v14 = vld [vmem:[#allocation2 + $0x10] sm:$0x3f]  ;;  %v2303_v15 = vld [vmem:[#allocation2 + $0x20] sm:$0xff]  ;;  %v360_v58 = vmul.f32 %v359_v56, %v2293_v10  ;;  %v363_v61 = vmul.f32 %v359_v56, %v2296_v12  ;;  %v398_v1 = vmul.f32 %v397_v63, %v2293_v10  ;;  %v401_v4 = vmul.f32 %v397_v63, %v2296_v12 }
  0x9e   :  { %v133_v16 = vmul.f32 %v131_v9, %v2299_v13  ;;  %v134_v17 = vmul.f32 %v131_v9, %v2301_v14  ;;  %v136_v19 = vmul.f32 %v131_v9, %v2303_v15  ;;  %v2311_v20 = vld [vmem:[#allocation2 + $0x28] sm:$0x3f]  ;;  %v171_v24 = vmul.f32 %v169_v21, %v2299_v13 }
  0x9f   :  { %v137_v22 = vmul.f32 %v131_v9, %v2311_v20  ;;  %v172_v25 = vmul.f32 %v169_v21, %v2301_v14  ;;  %v174_v27 = vmul.f32 %v169_v21, %v2303_v15  ;;  %v175_v29 = vmul.f32 %v169_v21, %v2311_v20 }
  0xa0   :  { %146 = vrot.lane.b32.xlu1 %v133_v16, %s2245_s6  ;;  %148 = vrot.lane.b32.xlu0 %v134_v17, %s2245_s6  ;;  %v209_v31 = vmul.f32 %v207_v28, %v2299_v13  ;;  %v210_v32 = vmul.f32 %v207_v28, %v2301_v14  ;;  %v212_v34 = vmul.f32 %v207_v28, %v2303_v15  ;;  %v582_v16 = vstv %s2138_s16  ;;  %s2854_s16 = sld [smem:[#allocation3 + $0x17]] }
  0xa1   :  { %v213_v36 = vmul.f32 %v207_v28, %v2311_v20  ;;  %v247_v38 = vmul.f32 %v245_v35, %v2299_v13  ;;  %v248_v39 = vmul.f32 %v245_v35, %v2301_v14  ;;  %v250_v41 = vmul.f32 %v245_v35, %v2303_v15 }
  0xa2   :  { %v251_v43 = vmul.f32 %v245_v35, %v2311_v20  ;;  %v285_v45 = vmul.f32 %v283_v42, %v2299_v13  ;;  %v286_v46 = vmul.f32 %v283_v42, %v2301_v14  ;;  %v288_v48 = vmul.f32 %v283_v42, %v2303_v15 }
  0xa3   :  { %v289_v50 = vmul.f32 %v283_v42, %v2311_v20  ;;  %v323_v52 = vmul.f32 %v321_v49, %v2299_v13  ;;  %v324_v53 = vmul.f32 %v321_v49, %v2301_v14  ;;  %v326_v55 = vmul.f32 %v321_v49, %v2303_v15 }
  0xa4   :  { %150 = vrot.lane.b32.xlu1 %v135_v18, %s2245_s6  ;;  %152 = vrot.lane.b32.xlu0 %v136_v19, %s2245_s6  ;;  %v327_v57 = vmul.f32 %v321_v49, %v2311_v20  ;;  %v361_v59 = vmul.f32 %v359_v56, %v2299_v13  ;;  %v362_v60 = vmul.f32 %v359_v56, %v2301_v14 }
  0xa5   :  { %v364_v62 = vmul.f32 %v359_v56, %v2303_v15  ;;  %v365_v0 = vmul.f32 %v359_v56, %v2311_v20  ;;  %v399_v2 = vmul.f32 %v397_v63, %v2299_v13  ;;  %v400_v3 = vmul.f32 %v397_v63, %v2301_v14 }
  0xa6   :  { %v402_v5 = vmul.f32 %v397_v63, %v2303_v15  ;;  %v403_v7 = vmul.f32 %v397_v63, %v2311_v20  ;;  %v436_v8 = vmul.f32 %v435_v6, %v2293_v10  ;;  %v437_v9 = vmul.f32 %v435_v6, %v2299_v13 }
  0xa7   :  { %v438_v11 = vmul.f32 %v435_v6, %v2301_v14  ;;  %v439_v17 = vmul.f32 %v435_v6, %v2296_v12  ;;  %v440_v18 = vmul.f32 %v435_v6, %v2303_v15  ;;  %v585_v19 = vmul.f32 %v582_v16, %v2301_v14 }
  0xa8   :  { %154 = vrot.lane.b32.xlu1 %v137_v22, %s2245_s6  ;;  %182 = vrot.lane.b32.xlu0 %v170_v23, %s2245_s6  ;;  %v584_v21 = vmul.f32 %v582_v16, %v2299_v13  ;;  %v583_v22 = vmul.f32 %v582_v16, %v2293_v10  ;;  %v441_v23 = vmul.f32 %v435_v6, %v2311_v20 }
  0xaa   :  { %v595_v28 = vrot.slane %v583_v22, 1 }
  0xac   :  { %184 = vrot.lane.b32.xlu1 %v171_v24, %s2245_s6  ;;  %186 = vrot.lane.b32.xlu0 %v172_v25, %s2245_s6  ;;  %v598_v24 = vrot.slane %v585_v19, 1  ;;  %v588_v25 = vmul.f32 %v582_v16, %v2311_v20 }
  0xb0   :  { %188 = vrot.lane.b32.xlu1 %v173_v26, %s2245_s6  ;;  %190 = vrot.lane.b32.xlu0 %v174_v27, %s2245_s6  ;;  %v596_v26 = vrot.slane %v584_v21, 1  ;;  %v587_v27 = vmul.f32 %v582_v16, %v2303_v15 }
  0xb4   :  { %192 = vrot.lane.b32.xlu1 %v175_v29, %s2245_s6  ;;  %220 = vrot.lane.b32.xlu0 %v208_v30, %s2245_s6  ;;  %v603_v29 = vrot.slane %v588_v25, 1  ;;  %v586_v30 = vmul.f32 %v582_v16, %v2296_v12 }
  0xb8   :  { %222 = vrot.lane.b32.xlu1 %v209_v31, %s2245_s6  ;;  %224 = vrot.lane.b32.xlu0 %v210_v32, %s2245_s6  ;;  %v630_v31 = vstv %s2139_s17  ;;  %v597_v32 = vsel %vm486_vm6, %v595_v28, %v596_v26  ;;  %s2856_s17 = sld [smem:[#allocation3 + $0x22]] }
  0xb9   :  { %v631_v35 = vmul.f32 %v630_v31, %v2293_v10  ;;  %v635_v49 = vmul.f32 %v630_v31, %v2303_v15 }
  0xbb   :  { %v643_v42 = vrot.slane %v631_v35, 1  ;;  %v649_v56 = vrot.slane %v635_v49, 1 }
  0xbc   :  { %226 = vrot.lane.b32.xlu1 %v211_v33, %s2245_s6  ;;  %228 = vrot.lane.b32.xlu0 %v212_v34, %s2245_s6  ;;  %v601_v33 = vrot.slane %v587_v27, 1  ;;  %v632_v34 = vmul.f32 %v630_v31, %v2299_v13 }
  0xc0   :  { %230 = vrot.lane.b32.xlu1 %v213_v36, %s2245_s6  ;;  %258 = vrot.lane.b32.xlu0 %v246_v37, %s2246_s10  ;;  %v600_v37 = vrot.slane %v586_v30, 1 }
  0xc4   :  { %260 = vrot.lane.b32.xlu1 %v247_v38, %s2246_s10  ;;  %262 = vrot.lane.b32.xlu0 %v248_v39, %s2246_s10  ;;  %v599_v38 = vsel %vm486_vm6, %v596_v26, %v598_v24  ;;  %v604_v39 = vsel %vm486_vm6, %v601_v33, %v603_v29 }
  0xc8   :  { %264 = vrot.lane.b32.xlu1 %v249_v40, %s2246_s10  ;;  %266 = vrot.lane.b32.xlu0 %v250_v41, %s2246_s10  ;;  %v644_v40 = vrot.slane %v632_v34, 1  ;;  %v633_v41 = vmul.f32 %v630_v31, %v2301_v14 }
  0xcc   :  { %268 = vrot.lane.b32.xlu1 %v251_v43, %s2246_s10  ;;  %296 = vrot.lane.b32.xlu0 %v284_v44, %s2246_s10 }
  0xd0   :  { %298 = vrot.lane.b32.xlu1 %v285_v45, %s2246_s10  ;;  %300 = vrot.lane.b32.xlu0 %v286_v46, %s2246_s10  ;;  %v602_v45 = vsel %vm486_vm6, %v600_v37, %v601_v33  ;;  %v634_v46 = vmul.f32 %v630_v31, %v2296_v12 }
  0xd4   :  { %302 = vrot.lane.b32.xlu1 %v287_v47, %s2246_s10  ;;  %304 = vrot.lane.b32.xlu0 %v288_v48, %s2246_s10  ;;  %v645_v47 = vsel %vm486_vm6, %v643_v42, %v644_v40  ;;  %v646_v48 = vrot.slane %v633_v41, 1 }
  0xd8   :  { %306 = vrot.lane.b32.xlu1 %v289_v50, %s2246_s10  ;;  %334 = vrot.lane.b32.xlu0 %v322_v51, %s2246_s10  ;;  %v636_v50 = vmul.f32 %v630_v31, %v2311_v20 }
  0xdc   :  { %336 = vrot.lane.b32.xlu1 %v323_v52, %s2246_s10  ;;  %338 = vrot.lane.b32.xlu0 %v324_v53, %s2246_s10  ;;  %v648_v53 = vrot.slane %v634_v46, 1 }
  0xde   :  { %v650_v63 = vsel %vm486_vm6, %v648_v53, %v649_v56 }
  0xe0   :  { %340 = vrot.lane.b32.xlu1 %v325_v54, %s2246_s10  ;;  %342 = vrot.lane.b32.xlu0 %v326_v55, %s2246_s10  ;;  %v678_v54 = vstv %s2140_s18  ;;  %v647_v55 = vsel %vm486_vm6, %v644_v40, %v646_v48  ;;  %v774_v40 = vstv %s2142_s20  ;;  %s2863_s18 = sld [smem:[#allocation3 + $0x27]]  ;;  %s2897_s20 = sld [smem:[#allocation3 + $0x11]] }
  0xe4   :  { %344 = vrot.lane.b32.xlu1 %v327_v57, %s2246_s10  ;;  %372 = vrot.lane.b32.xlu0 %v360_v58, %s2247_s14  ;;  %v651_v57 = vrot.slane %v636_v50, 1  ;;  %v680_v58 = vmul.f32 %v678_v54, %v2299_v13  ;;  %v775_v50 = vmul.f32 %v774_v40, %v2293_v10 }
  0xe8   :  { %374 = vrot.lane.b32.xlu1 %v361_v59, %s2247_s14  ;;  %376 = vrot.lane.b32.xlu0 %v362_v60, %s2247_s14  ;;  %v679_v59 = vmul.f32 %v678_v54, %v2293_v10 }
  0xec   :  { %378 = vrot.lane.b32.xlu1 %v363_v61, %s2247_s14  ;;  %380 = vrot.lane.b32.xlu0 %v364_v62, %s2247_s14  ;;  %v681_v62 = vmul.f32 %v678_v54, %v2301_v14 }
  0xf0   :  { %382 = vrot.lane.b32.xlu1 %v365_v0, %s2247_s14  ;;  %410 = vrot.lane.b32.xlu0 %v398_v1, %s2247_s14  ;;  %v652_v0 = vsel %vm486_vm6, %v649_v56, %v651_v57  ;;  %v692_v1 = vrot.slane %v680_v58, 1 }
  0xf4   :  { %412 = vrot.lane.b32.xlu1 %v399_v2, %s2247_s14  ;;  %414 = vrot.lane.b32.xlu0 %v400_v3, %s2247_s14  ;;  %v691_v2 = vrot.slane %v679_v59, 1  ;;  %v787_v59 = vrot.slane %v775_v50, 1  ;;  %v870_v50 = vstv %s2144_s22  ;;  %s3745_s22 = sld [smem:[#allocation3 + $0x10]] }
  0xf6   :  { %v693_v6 = vsel %vm486_vm6, %v691_v2, %v692_v1  ;;  %v778_v2 = vmul.f32 %v774_v40, %v2296_v12 }
  0xf8   :  { %416 = vrot.lane.b32.xlu1 %v401_v4, %s2247_s14  ;;  %418 = vrot.lane.b32.xlu0 %v402_v5, %s2247_s14  ;;  %v694_v5 = vrot.slane %v681_v62, 1 }
  0xfc   :  { %420 = vrot.lane.b32.xlu1 %v403_v7, %s2247_s14  ;;  %448 = vrot.lane.b32.xlu0 %v436_v8, %s2247_s14  ;;  %v682_v7 = vmul.f32 %v678_v54, %v2296_v12  ;;  %v683_v8 = vmul.f32 %v678_v54, %v2303_v15 }
  0xfe   :  { %v696_v19 = vrot.slane %v682_v7, 1  ;;  %v697_v21 = vrot.slane %v683_v8, 1 }
 0x100   :  { %450 = vrot.lane.b32.xlu1 %v437_v9, %s2247_s14  ;;  %452 = vrot.lane.b32.xlu0 %v438_v11, %s2247_s14  ;;  %v684_v9 = vmul.f32 %v678_v54, %v2311_v20  ;;  %v698_v27 = vsel %vm486_vm6, %v696_v19, %v697_v21 }
 0x102   :  { %v699_v22 = vrot.slane %v684_v9, 1 }
 0x104   :  { %454 = vrot.lane.b32.xlu1 %v439_v17, %s2247_s14  ;;  %456 = vrot.lane.b32.xlu0 %v440_v18, %s2247_s14  ;;  %v695_v17 = vsel %vm486_vm6, %v692_v1, %v694_v5  ;;  %v726_v18 = vstv %s2141_s19  ;;  %v700_v28 = vsel %vm486_vm6, %v697_v21, %v699_v22  ;;  %s2865_s19 = sld [smem:[#allocation3 + $0x1]] }
 0x105   :  { %v729_v30 = vmul.f32 %v726_v18, %v2301_v14  ;;  %v730_v34 = vmul.f32 %v726_v18, %v2296_v12 }
 0x107   :  { %v742_v37 = vrot.slane %v729_v30, 1 }
 0x108   :  { %458 = vrot.lane.b32.xlu1 %v441_v23, %s2247_s14  ;;  %609 = vrot.lane.b32.xlu0 %v598_v24, %s2245_s6  ;;  %v728_v23 = vmul.f32 %v726_v18, %v2299_v13  ;;  %v727_v24 = vmul.f32 %v726_v18, %v2293_v10 }
 0x10a   :  { %v739_v31 = vrot.slane %v727_v24, 1 }
 0x10c   :  { %615 = vrot.lane.b32.xlu1 %v603_v29, %s2245_s6  ;;  %605 = vrot.lane.b32.xlu0 %v597_v32, %s2245_s6  ;;  %v740_v29 = vrot.slane %v728_v23, 1 }
 0x10e   :  { %v2425_v36 = vpop.permute.xlu0 %144  ;;  %v741_v35 = vsel %vm486_vm6, %v739_v31, %v740_v29  ;;  %v743_v46 = vsel %vm486_vm6, %v740_v29, %v742_v37 }
 0x110   :  { %607 = vrot.lane.b32.xlu1 %v599_v38, %s2245_s6  ;;  %613 = vrot.lane.b32.xlu0 %v604_v39, %s2245_s6  ;;  %v731_v38 = vmul.f32 %v726_v18, %v2303_v15  ;;  %v732_v39 = vmul.f32 %v726_v18, %v2311_v20  ;;  %v792_v18 = vrot.slane %v778_v2, 1 }
 0x112   :  { %v2432_v43 = vpop.permute.xlu1 %146  ;;  %v2434_v44 = vpop.permute.xlu0 %148  ;;  %v747_v49 = vrot.slane %v732_v39, 1 }
 0x113   :  { %4112 = vst [vmem:[#allocation9_spill] sm:$0xff] %v2434_v44 }
 0x114   :  { %611 = vrot.lane.b32.xlu1 %v602_v45, %s2245_s6  ;;  %653 = vrot.lane.b32.xlu0 %v645_v47, %s2245_s6  ;;  %v776_v45 = vmul.f32 %v774_v40, %v2299_v13  ;;  %v744_v47 = vrot.slane %v730_v34, 1 }
 0x116   :  { %v2443_v51 = vpop.permute.xlu1 %150  ;;  %v2445_v52 = vpop.permute.xlu0 %152  ;;  %v788_v58 = vrot.slane %v776_v45, 1 }
 0x118   :  { %655 = vrot.lane.b32.xlu1 %v647_v55, %s2245_s6  ;;  %657 = vrot.lane.b32.xlu0 %v646_v48, %s2245_s6  ;;  %v745_v48 = vrot.slane %v731_v38, 1  ;;  %v777_v55 = vmul.f32 %v774_v40, %v2301_v14  ;;  %v789_v1 = vsel %vm486_vm6, %v787_v59, %v788_v58  ;;  %v871_v59 = vmul.f32 %v870_v50, %v2293_v10 }
 0x11a   :  { %v2452_v60 = vpop.permute.xlu1 %154  ;;  %v2454_v61 = vpop.permute.xlu0 %182  ;;  %v746_v56 = vsel %vm486_vm6, %v744_v47, %v745_v48 }
 0x11b   :  { %4113 = vst [vmem:[#allocation10_spill] sm:$0xff] %v2452_v60  ;;  %4114 = vst [vmem:[#allocation11_spill] sm:$0xff] %v2454_v61 }
 0x11c   :  { %659 = vrot.lane.b32.xlu1 %v650_v63, %s2245_s6  ;;  %661 = vrot.lane.b32.xlu0 %v652_v0, %s2245_s6  ;;  %v790_v0 = vrot.slane %v777_v55, 1 }
 0x11e   :  { %v2461_v3 = vpop.permute.xlu1 %184  ;;  %v2463_v4 = vpop.permute.xlu0 %186  ;;  %v791_v9 = vsel %vm486_vm6, %v788_v58, %v790_v0  ;;  %v872_v58 = vmul.f32 %v870_v50, %v2299_v13 }
 0x11f   :  { %4115 = vst [vmem:[#allocation12_spill] sm:$0xff] %v2461_v3  ;;  %4116 = vst [vmem:[#allocation13_spill] sm:$0xff] %v2463_v4 }
 0x120   :  { %663 = vrot.lane.b32.xlu1 %v651_v57, %s2245_s6  ;;  %701 = vrot.lane.b32.xlu0 %v693_v6, %s2245_s6  ;;  %v748_v57 = vsel %vm486_vm6, %v745_v48, %v747_v49  ;;  %v780_v6 = vmul.f32 %v774_v40, %v2311_v20 }
 0x122   :  { %v2471_v11 = vpop.permute.xlu1 %188  ;;  %v2473_v16 = vpop.permute.xlu0 %190  ;;  %v795_v21 = vrot.slane %v780_v6, 1  ;;  %v884_v6 = vrot.slane %v872_v58, 1 }
 0x123   :  { %4117 = vst [vmem:[#allocation14_spill] sm:$0xff] %v2471_v11  ;;  %v2794_v11 = vld [vmem:[#allocation2 + $0x8] sm:$0xff] }
 0x124   :  { %703 = vrot.lane.b32.xlu1 %v695_v17, %s2245_s6  ;;  %705 = vrot.lane.b32.xlu0 %v694_v5, %s2245_s6  ;;  %v779_v5 = vmul.f32 %v774_v40, %v2303_v15  ;;  %v822_v17 = vstv %s2143_s21  ;;  %s3207_s21 = sld [smem:[#allocation3 + $0x21]] }
 0x125   :  { %v823_v23 = vmul.f32 %v822_v17, %v2293_v10  ;;  %v825_v31 = vmul.f32 %v822_v17, %v2301_v14  ;;  %v826_v38 = vmul.f32 %v822_v17, %v2296_v12  ;;  %v827_v45 = vmul.f32 %v822_v17, %v2303_v15 }
 0x126   :  { %v2480_v25 = vpop.permute.xlu1 %192  ;;  %v2482_v26 = vpop.permute.xlu0 %220  ;;  %v793_v19 = vrot.slane %v779_v5, 1 }
 0x127   :  { %4118 = vst [vmem:[#allocation15_spill] sm:$0xff] %v2480_v25  ;;  %v835_v34 = vrot.slane %v823_v23, 1  ;;  %v838_v40 = vrot.slane %v825_v31, 1 }
 0x128   :  { %707 = vrot.lane.b32.xlu1 %v698_v27, %s2245_s6  ;;  %709 = vrot.lane.b32.xlu0 %v700_v28, %s2245_s6  ;;  %v794_v28 = vsel %vm486_vm6, %v792_v18, %v793_v19  ;;  %v796_v29 = vsel %vm486_vm6, %v793_v19, %v795_v21 }
 0x12a   :  { %v2489_v32 = vpop.permute.xlu1 %222  ;;  %v2491_v33 = vpop.permute.xlu0 %224 }
 0x12b   :  { %4119 = vst [vmem:[#allocation16_spill] sm:$0xff] %v2491_v33 }
 0x12c   :  { %711 = vrot.lane.b32.xlu1 %v699_v22, %s2245_s6  ;;  %749 = vrot.lane.b32.xlu0 %v741_v35, %s2246_s10  ;;  %v824_v22 = vmul.f32 %v822_v17, %v2299_v13 }
 0x12e   :  { %v2499_v41 = vpop.permute.xlu1 %226  ;;  %v2501_v42 = vpop.permute.xlu0 %228  ;;  %v836_v30 = vrot.slane %v824_v22, 1 }
 0x12f   :  { %4120 = vst [vmem:[#allocation17_spill] sm:$0xff] %v2501_v42 }
 0x130   :  { %751 = vrot.lane.b32.xlu1 %v743_v46, %s2246_s10  ;;  %753 = vrot.lane.b32.xlu0 %v742_v37, %s2246_s10  ;;  %v837_v39 = vsel %vm486_vm6, %v835_v34, %v836_v30  ;;  %v828_v46 = vmul.f32 %v822_v17, %v2311_v20  ;;  %v839_v55 = vsel %vm486_vm6, %v836_v30, %v838_v40  ;;  %v883_v17 = vrot.slane %v871_v59, 1 }
 0x132   :  { %v2508_v53 = vpop.permute.xlu1 %230  ;;  %v2510_v54 = vpop.permute.xlu0 %258  ;;  %v885_v22 = vsel %vm486_vm6, %v883_v17, %v884_v6 }
 0x133   :  { %4121 = vst [vmem:[#allocation18_spill] sm:$0xff] %v2508_v53  ;;  %4122 = vst [vmem:[#allocation19_spill] sm:$0xff] %v2510_v54 }
 0x134   :  { %755 = vrot.lane.b32.xlu1 %v746_v56, %s2246_s10  ;;  %757 = vrot.lane.b32.xlu0 %v748_v57, %s2246_s10  ;;  %v841_v56 = vrot.slane %v827_v45, 1  ;;  %v843_v57 = vrot.slane %v828_v46, 1 }
 0x136   :  { %v2517_v62 = vpop.permute.xlu1 %260  ;;  %v2519_v63 = vpop.permute.xlu0 %262  ;;  %v844_v5 = vsel %vm486_vm6, %v841_v56, %v843_v57 }
 0x137   :  { %4123 = vst [vmem:[#allocation20_spill] sm:$0xff] %v2517_v62  ;;  %4124 = vst [vmem:[#allocation21_spill] sm:$0xff] %v2519_v63 }
 0x138   :  { %759 = vrot.lane.b32.xlu1 %v747_v49, %s2246_s10  ;;  %797 = vrot.lane.b32.xlu0 %v789_v1, %s2246_s10  ;;  %v840_v49 = vrot.slane %v826_v38, 1  ;;  %v918_v38 = vstv %s2145_s23  ;;  %s2159_s23 = sld [smem:[#allocation3 + $0x3]] }
 0x139   :  { %v920_v46 = vmul.f32 %v918_v38, %v2299_v13  ;;  %v921_v59 = vmul.f32 %v918_v38, %v2301_v14 }
 0x13a   :  { %v2527_v7 = vpop.permute.xlu1 %264  ;;  %v2529_v8 = vpop.permute.xlu0 %266  ;;  %v842_v2 = vsel %vm486_vm6, %v840_v49, %v841_v56  ;;  %v919_v49 = vmul.f32 %v918_v38, %v2293_v10 }
 0x13b   :  { %4125 = vst [vmem:[#allocation22_spill] sm:$0xff] %v2527_v7  ;;  %4126 = vst [vmem:[#allocation23_spill] sm:$0xff] %v2529_v8  ;;  %v932_v58 = vrot.slane %v920_v46, 1 }
 0x13c   :  { %799 = vrot.lane.b32.xlu1 %v791_v9, %s2246_s10  ;;  %801 = vrot.lane.b32.xlu0 %v790_v0, %s2246_s10  ;;  %v873_v9 = vmul.f32 %v870_v50, %v2301_v14 }
 0x13e   :  { %v2536_v24 = vpop.permute.xlu1 %268  ;;  %v2538_v27 = vpop.permute.xlu0 %296  ;;  %v886_v23 = vrot.slane %v873_v9, 1  ;;  %v922_v9 = vmul.f32 %v918_v38, %v2296_v12 }
 0x13f   :  { %4127 = vst [vmem:[#allocation24_spill] sm:$0xff] %v2536_v24  ;;  %4128 = vst [vmem:[#allocation25_spill] sm:$0xff] %v2538_v27 }
 0x140   :  { %803 = vrot.lane.b32.xlu1 %v794_v28, %s2246_s10  ;;  %805 = vrot.lane.b32.xlu0 %v796_v29, %s2246_s10  ;;  %v875_v28 = vmul.f32 %v870_v50, %v2303_v15  ;;  %v876_v29 = vmul.f32 %v870_v50, %v2311_v20 }
 0x142   :  { %v2545_v35 = vpop.permute.xlu1 %298  ;;  %v2547_v37 = vpop.permute.xlu0 %300  ;;  %v891_v45 = vrot.slane %v876_v29, 1 }
 0x143   :  { %4129 = vst [vmem:[#allocation26_spill] sm:$0xff] %v2545_v35  ;;  %4130 = vst [vmem:[#allocation27_spill] sm:$0xff] %v2547_v37 }
 0x144   :  { %807 = vrot.lane.b32.xlu1 %v795_v21, %s2246_s10  ;;  %845 = vrot.lane.b32.xlu0 %v837_v39, %s2246_s10  ;;  %v874_v21 = vmul.f32 %v870_v50, %v2296_v12  ;;  %v887_v39 = vsel %vm486_vm6, %v884_v6, %v886_v23 }
 0x146   :  { %v2555_v47 = vpop.permute.xlu1 %302  ;;  %v2557_v48 = vpop.permute.xlu0 %304  ;;  %v888_v34 = vrot.slane %v874_v21, 1  ;;  %v934_v21 = vrot.slane %v921_v59, 1 }
 0x147   :  { %4131 = vst [vmem:[#allocation28_spill] sm:$0xff] %v2555_v47  ;;  %v1363_v47 = vstv %s2155_s29 }
 0x148   :  { %847 = vrot.lane.b32.xlu1 %v839_v55, %s2246_s10  ;;  %849 = vrot.lane.b32.xlu0 %v838_v40, %s2246_s10  ;;  %v889_v40 = vrot.slane %v875_v28, 1 }
 0x14a   :  { %v2564_v0 = vpop.permute.xlu1 %306  ;;  %v2566_v1 = vpop.permute.xlu0 %334  ;;  %v890_v56 = vsel %vm486_vm6, %v888_v34, %v889_v40  ;;  %v936_v34 = vrot.slane %v922_v9, 1 }
 0x14b   :  { %4132 = vst [vmem:[#allocation29_spill] sm:$0xff] %v2564_v0 }
 0x14c   :  { %851 = vrot.lane.b32.xlu1 %v842_v2, %s2246_s10  ;;  %853 = vrot.lane.b32.xlu0 %v844_v5, %s2246_s10  ;;  %v931_v2 = vrot.slane %v919_v49, 1 }
 0x14e   :  { %v2573_v18 = vpop.permute.xlu1 %336  ;;  %v2575_v19 = vpop.permute.xlu0 %338  ;;  %v933_v17 = vsel %vm486_vm6, %v931_v2, %v932_v58 }
 0x14f   :  { %4133 = vst [vmem:[#allocation30_spill] sm:$0xff] %v2575_v19 }
 0x150   :  { %855 = vrot.lane.b32.xlu1 %v843_v57, %s2246_s10  ;;  %893 = vrot.lane.b32.xlu0 %v885_v22, %s2247_s14  ;;  %v892_v57 = vsel %vm486_vm6, %v889_v40, %v891_v45  ;;  %v923_v22 = vmul.f32 %v918_v38, %v2303_v15  ;;  %v935_v40 = vsel %vm486_vm6, %v932_v58, %v934_v21 }
 0x152   :  { %v2583_v30 = vpop.permute.xlu1 %340  ;;  %v2585_v31 = vpop.permute.xlu0 %342  ;;  %v937_v46 = vrot.slane %v923_v22, 1 }
 0x153   :  { %4134 = vst [vmem:[#allocation31_spill] sm:$0xff] %v2583_v30  ;;  %4135 = vst [vmem:[#allocation32_spill] sm:$0xff] %v2585_v31 }
 0x154   :  { %895 = vrot.lane.b32.xlu1 %v887_v39, %s2247_s14  ;;  %897 = vrot.lane.b32.xlu0 %v886_v23, %s2247_s14  ;;  %v924_v23 = vmul.f32 %v918_v38, %v2311_v20  ;;  %v966_v39 = vstv %s2146_s24  ;;  %v938_v59 = vsel %vm486_vm6, %v936_v34, %v937_v46  ;;  %s2160_s24 = sld [smem:[#allocation3 + $0x13]] }
 0x155   :  { %v967_v38 = vmul.f32 %v966_v39, %v2293_v10  ;;  %v969_v9 = vmul.f32 %v966_v39, %v2301_v14  ;;  %v971_v34 = vmul.f32 %v966_v39, %v2303_v15 }
 0x156   :  { %v2592_v50 = vpop.permute.xlu1 %344  ;;  %v2594_v55 = vpop.permute.xlu0 %372  ;;  %v939_v49 = vrot.slane %v924_v23, 1  ;;  %v970_v23 = vmul.f32 %v966_v39, %v2296_v12 }
 0x157   :  { %4136 = vst [vmem:[#allocation33_spill] sm:$0xff] %v2592_v50  ;;  %4137 = vst [vmem:[#allocation34_spill] sm:$0xff] %v2594_v55  ;;  %v982_v37 = vrot.slane %v969_v9, 1 }
 0x158   :  { %899 = vrot.lane.b32.xlu1 %v890_v56, %s2247_s14  ;;  %901 = vrot.lane.b32.xlu0 %v892_v57, %s2247_s14  ;;  %v968_v56 = vmul.f32 %v966_v39, %v2299_v13  ;;  %v940_v2 = vsel %vm486_vm6, %v937_v46, %v939_v49  ;;  %v972_v46 = vmul.f32 %v966_v39, %v2311_v20 }
 0x15a   :  { %v2601_v5 = vpop.permute.xlu1 %374  ;;  %v2603_v6 = vpop.permute.xlu0 %376  ;;  %v980_v58 = vrot.slane %v968_v56, 1  ;;  %v987_v24 = vrot.slane %v972_v46, 1 }
 0x15b   :  { %4138 = vst [vmem:[#allocation35_spill] sm:$0xff] %v2601_v5  ;;  %4139 = vst [vmem:[#allocation36_spill] sm:$0xff] %v2603_v6  ;;  %v1171_v6 = vstv %s2151_s26 }
 0x15c   :  { %903 = vrot.lane.b32.xlu1 %v891_v45, %s2247_s14  ;;  %941 = vrot.lane.b32.xlu0 %v933_v17, %s2247_s14  ;;  %v979_v17 = vrot.slane %v967_v38, 1  ;;  %v1175_v44 = vmul.f32 %v1171_v6, %v2296_v12 }
 0x15e   :  { %v2611_v28 = vpop.permute.xlu1 %378  ;;  %v2613_v29 = vpop.permute.xlu0 %380 }
 0x15f   :  { %4140 = vst [vmem:[#allocation37_spill] sm:$0xff] %v2611_v28  ;;  %4141 = vst [vmem:[#allocation38_spill] sm:$0xff] %v2613_v29 }
 0x160   :  { %943 = vrot.lane.b32.xlu1 %v935_v40, %s2247_s14  ;;  %945 = vrot.lane.b32.xlu0 %v934_v21, %s2247_s14  ;;  %v981_v40 = vsel %vm486_vm6, %v979_v17, %v980_v58 }
 0x162   :  { %v2620_v45 = vpop.permute.xlu1 %382  ;;  %v2622_v57 = vpop.permute.xlu0 %410 }
 0x163   :  { %4142 = vst [vmem:[#allocation39_spill] sm:$0xff] %v2620_v45  ;;  %4143 = vst [vmem:[#allocation40_spill] sm:$0xff] %v2622_v57  ;;  %v985_v45 = vrot.slane %v971_v34, 1  ;;  %v2893_v57 = vstv %s2833_s8 }
 0x164   :  { %947 = vrot.lane.b32.xlu1 %v938_v59, %s2247_s14  ;;  %949 = vrot.lane.b32.xlu0 %v940_v2, %s2247_s14  ;;  %v984_v59 = vrot.slane %v970_v23, 1  ;;  %v1123_v2 = vstv %s2150_s25 }
 0x165   :  { %v1125_v9 = vmul.f32 %v1123_v2, %v2299_v13  ;;  %v1124_v39 = vmul.f32 %v1123_v2, %v2293_v10  ;;  %v1126_v34 = vmul.f32 %v1123_v2, %v2301_v14  ;;  %v1127_v4 = vmul.f32 %v1123_v2, %v2296_v12 }
 0x166   :  { %v2629_v21 = vpop.permute.xlu1 %412  ;;  %v2631_v22 = vpop.permute.xlu0 %414  ;;  %v986_v23 = vsel %vm486_vm6, %v984_v59, %v985_v45 }
 0x167   :  { %4144 = vst [vmem:[#allocation41_spill] sm:$0xff] %v2629_v21  ;;  %4145 = vst [vmem:[#allocation42_spill] sm:$0xff] %v2631_v22  ;;  %v983_v22 = vsel %vm486_vm6, %v980_v58, %v982_v37  ;;  %v1137_v58 = vrot.slane %v1125_v9, 2  ;;  %v1139_v59 = vrot.slane %v1126_v34, 2  ;;  %v1129_v9 = vmul.f32 %v1123_v2, %v2311_v20 }
 0x168   :  { %951 = vrot.lane.b32.xlu1 %v939_v49, %s2247_s14  ;;  %989 = vrot.lane.b32.xlu0 %v981_v40, %s2247_s14  ;;  %v988_v40 = vsel %vm486_vm6, %v985_v45, %v987_v24  ;;  %v1128_v45 = vmul.f32 %v1123_v2, %v2303_v15  ;;  %v1173_v34 = vmul.f32 %v1171_v6, %v2299_v13 }
 0x169   :  { %v1140_v63 = vsel %vm1027_vm7, %v1137_v58, %v1139_v59  ;;  %v1144_v53 = vrot.slane %v1129_v9, 2 }
 0x16a   :  { %v2639_v56 = vpop.permute.xlu1 %416  ;;  %v2641_v38 = vpop.permute.xlu0 %418  ;;  %v1142_v50 = vrot.slane %v1128_v45, 2  ;;  %v1185_v45 = vrot.slane %v1173_v34, 2 }
 0x16b   :  { %4146 = vst [vmem:[#allocation43_spill] sm:$0xff] %v2639_v56 }
 0x16c   :  { %991 = vrot.lane.b32.xlu1 %v983_v22, %s2247_s14  ;;  %993 = vrot.lane.b32.xlu0 %v982_v37, %s2247_s14  ;;  %v1136_v37 = vrot.slane %v1124_v39, 2 }
 0x16e   :  { %v2648_v49 = vpop.permute.xlu1 %420  ;;  %v2650_v17 = vpop.permute.xlu0 %448  ;;  %v1138_v60 = vsel %vm1027_vm7, %v1136_v37, %v1137_v58  ;;  %v1174_v37 = vmul.f32 %v1171_v6, %v2301_v14  ;;  %v1145_v58 = vsel %vm1027_vm7, %v1142_v50, %v1144_v53 }
 0x16f   :  { %4147 = vst [vmem:[#allocation44_spill] sm:$0xff] %v2648_v49 }
 0x170   :  { %995 = vrot.lane.b32.xlu1 %v986_v23, %s2247_s14  ;;  %997 = vrot.lane.b32.xlu0 %v988_v40, %s2247_s14  ;;  %v1141_v40 = vrot.slane %v1127_v4, 2 }
 0x172   :  { %v2657_v22 = vpop.permute.xlu1 %450  ;;  %v2659_v46 = vpop.permute.xlu0 %452  ;;  %v1143_v4 = vsel %vm1027_vm7, %v1141_v40, %v1142_v50  ;;  %v1177_v40 = vmul.f32 %v1171_v6, %v2311_v20 }
 0x173   :  { %4148 = vst [vmem:[#allocation45_spill] sm:$0xff] %v2657_v22  ;;  %4149 = vst [vmem:[#allocation46_spill] sm:$0xff] %v2659_v46  ;;  %v1176_v46 = vmul.f32 %v1171_v6, %v2303_v15 }
 0x174   :  { %999 = vrot.lane.b32.xlu1 %v987_v24, %s2247_s14  ;;  %1146 = vrot.lane.b32.xlu0 %v1138_v60, %s2245_s6  ;;  %v1172_v24 = vmul.f32 %v1171_v6, %v2293_v10 }
 0x176   :  { %v2667_v23 = vpop.permute.xlu1 %454  ;;  %v2669_v39 = vpop.permute.xlu0 %456 }
 0x177   :  { %4150 = vst [vmem:[#allocation47_spill] sm:$0xff] %v2667_v23  ;;  %4151 = vst [vmem:[#allocation48_spill] sm:$0xff] %v2669_v39 }
 0x178   :  { %1148 = vrot.lane.b32.xlu1 %v1140_v63, %s2245_s6  ;;  %1150 = vrot.lane.b32.xlu0 %v1139_v59, %s2245_s6  ;;  %v1184_v63 = vrot.slane %v1172_v24, 2 }
 0x17a   :  { %v2676_v2 = vpop.permute.xlu1 %458  ;;  %v2678_v60 = vpop.permute.xlu0 %609 }
 0x17b   :  { %4152 = vst [vmem:[#allocation49_spill] sm:$0xff] %v2676_v2  ;;  %4153 = vst [vmem:[#allocation50_spill] sm:$0xff] %v2678_v60  ;;  %v1187_v2 = vrot.slane %v1174_v37, 2  ;;  %v1186_v60 = vsel %vm1027_vm7, %v1184_v63, %v1185_v45  ;;  %v1189_v37 = vrot.slane %v1175_v44, 2  ;;  %v1192_v63 = vrot.slane %v1177_v40, 2 }
 0x17c   :  { %1152 = vrot.lane.b32.xlu1 %v1143_v4, %s2245_s6  ;;  %1154 = vrot.lane.b32.xlu0 %v1145_v58, %s2245_s6  ;;  %v1219_v4 = vstv %s2152_s27  ;;  %v1190_v58 = vrot.slane %v1176_v46, 2 }
 0x17d   :  { %v1188_v24 = vsel %vm1027_vm7, %v1185_v45, %v1187_v2  ;;  %v1222_v46 = vmul.f32 %v1219_v4, %v2301_v14  ;;  %v1223_v49 = vmul.f32 %v1219_v4, %v2296_v12 }
 0x17e   :  { %v2685_v59 = vpop.permute.xlu1 %615  ;;  %v2687_v9 = vpop.permute.xlu0 %605  ;;  %v1191_v19 = vsel %vm1027_vm7, %v1189_v37, %v1190_v58  ;;  %v1193_v45 = vsel %vm1027_vm7, %v1190_v58, %v1192_v63  ;;  %v1224_v37 = vmul.f32 %v1219_v4, %v2303_v15 }
 0x17f   :  { %4154 = vst [vmem:[#allocation51_spill] sm:$0xff] %v2685_v59  ;;  %4155 = vst [vmem:[#allocation52_spill] sm:$0xff] %v2687_v9  ;;  %v1221_v59 = vmul.f32 %v1219_v4, %v2299_v13  ;;  %v1235_v0 = vrot.slane %v1222_v46, 2 }
 0x180   :  { %1156 = vrot.lane.b32.xlu1 %v1144_v53, %s2245_s6  ;;  %1194 = vrot.lane.b32.xlu0 %v1186_v60, %s2245_s6  ;;  %v1220_v53 = vmul.f32 %v1219_v4, %v2293_v10 }
 0x181   :  { %v1233_v44 = vrot.slane %v1221_v59, 2  ;;  %v1225_v59 = vmul.f32 %v1219_v4, %v2311_v20 }
 0x182   :  { %v2695_v50 = vpop.permute.xlu1 %607  ;;  %v2697_v34 = vpop.permute.xlu0 %613  ;;  %v1232_v40 = vrot.slane %v1220_v53, 2  ;;  %v1237_v53 = vrot.slane %v1223_v49, 2 }
 0x183   :  { %4156 = vst [vmem:[#allocation53_spill] sm:$0xff] %v2695_v50  ;;  %4157 = vst [vmem:[#allocation54_spill] sm:$0xff] %v2697_v34  ;;  %v1240_v56 = vrot.slane %v1225_v59, 2  ;;  %v2907_v50 = vstv %s2846_s13 }
 0x184   :  { %1196 = vrot.lane.b32.xlu1 %v1188_v24, %s2245_s6  ;;  %1198 = vrot.lane.b32.xlu0 %v1187_v2, %s2245_s6  ;;  %v1234_v33 = vsel %vm1027_vm7, %v1232_v40, %v1233_v44 }
 0x186   :  { %v2704_v6 = vpop.permute.xlu1 %611  ;;  %v2706_v60 = vpop.permute.xlu0 %653 }
 0x187   :  { %4158 = vst [vmem:[#allocation55_spill] sm:$0xff] %v2704_v6  ;;  %4159 = vst [vmem:[#allocation56_spill] sm:$0xff] %v2706_v60  ;;  %v2784_v60 = vld [vmem:[#allocation2 + $0x28] sm:$0x3f]  ;;  %v1365_v6 = vmul.f32 %v2794_v11, %v1363_v47 }
 0x188   :  { %1200 = vrot.lane.b32.xlu1 %v1191_v19, %s2245_s6  ;;  %1202 = vrot.lane.b32.xlu0 %v1193_v45, %s2245_s6  ;;  %v1267_v45 = vstv %s2153_s28 }
 0x189   :  { %v1269_v46 = vmul.f32 %v1267_v45, %v2299_v13  ;;  %v1268_v4 = vmul.f32 %v1267_v45, %v2293_v10  ;;  %v1271_v59 = vmul.f32 %v1267_v45, %v2296_v12 }
 0x18a   :  { %v2713_v2 = vpop.permute.xlu1 %655  ;;  %v2715_v24 = vpop.permute.xlu0 %657 }
 0x18b   :  { %4160 = vst [vmem:[#allocation57_spill] sm:$0xff] %v2713_v2  ;;  %4161 = vst [vmem:[#allocation58_spill] sm:$0xff] %v2715_v24  ;;  %v1236_v24 = vsel %vm1027_vm7, %v1233_v44, %v1235_v0  ;;  %v1238_v2 = vrot.slane %v1224_v37, 2  ;;  %v1281_v44 = vrot.slane %v1269_v46, 2  ;;  %v1270_v37 = vmul.f32 %v1267_v45, %v2301_v14 }
 0x18c   :  { %1204 = vrot.lane.b32.xlu1 %v1192_v63, %s2245_s6  ;;  %1242 = vrot.lane.b32.xlu0 %v1234_v33, %s2245_s6 }
 0x18d   :  { %v1239_v49 = vsel %vm1027_vm7, %v1237_v53, %v1238_v2  ;;  %v1241_v40 = vsel %vm1027_vm7, %v1238_v2, %v1240_v56  ;;  %v1272_v53 = vmul.f32 %v1267_v45, %v2303_v15  ;;  %v1273_v2 = vmul.f32 %v1267_v45, %v2311_v20  ;;  %v2759_v15 = vld [vmem:[#allocation2] sm:$0xff] }
 0x18e   :  { %v2723_v19 = vpop.permute.xlu1 %659  ;;  %v2725_v58 = vpop.permute.xlu0 %661 }
 0x18f   :  { %4162 = vst [vmem:[#allocation59_spill] sm:$0xff] %v2723_v19  ;;  %v1283_v19 = vrot.slane %v1270_v37, 2  ;;  %v1286_v12 = vrot.slane %v1272_v53, 2 }
 0x190   :  { %1244 = vrot.lane.b32.xlu1 %v1236_v24, %s2245_s6  ;;  %1246 = vrot.lane.b32.xlu0 %v1235_v0, %s2245_s6  ;;  %v1280_v24 = vrot.slane %v1268_v4, 2  ;;  %v1285_v4 = vrot.slane %v1271_v59, 2  ;;  %v2768_v59 = vld [vmem:[#allocation2 + $0x10] sm:$0x3f] }
 0x192   :  { %v2732_v63 = vpop.permute.xlu1 %663  ;;  %v2734_v33 = vpop.permute.xlu0 %701 }
 0x193   :  { %4163 = vst [vmem:[#allocation60_spill] sm:$0xff] %v2732_v63  ;;  %4164 = vst [vmem:[#allocation61_spill] sm:$0xff] %v2734_v33  ;;  %v1282_v63 = vsel %vm1027_vm7, %v1280_v24, %v1281_v44 }
 0x194   :  { %1248 = vrot.lane.b32.xlu1 %v1239_v49, %s2245_s6  ;;  %1250 = vrot.lane.b32.xlu0 %v1241_v40, %s2245_s6  ;;  %v1315_v49 = vstv %s2154_s0  ;;  %v1284_v40 = vsel %vm1027_vm7, %v1281_v44, %v1283_v19 }
 0x195   :  { %v1317_v37 = vmul.f32 %v1315_v49, %v2299_v13  ;;  %v1316_v20 = vmul.f32 %v2759_v15, %v1315_v49  ;;  %v1318_v13 = vmul.f32 %v2768_v59, %v1315_v49 }
 0x196   :  { %v2741_v0 = vpop.permute.xlu1 %703  ;;  %v2743_v10 = vpop.permute.xlu0 %705 }
 0x197   :  { %4165 = vst [vmem:[#allocation62_spill] sm:$0xff] %v2741_v0  ;;  %4166 = vst [vmem:[#allocation63_spill] sm:$0xff] %v2743_v10  ;;  %v1288_v10 = vrot.slane %v1273_v2, 2  ;;  %v1329_v24 = vrot.slane %v1317_v37, 2  ;;  %v1331_v37 = vrot.slane %v1318_v13, 2 }
 0x198   :  { %1252 = vrot.lane.b32.xlu1 %v1240_v56, %s2245_s6  ;;  %1290 = vrot.lane.b32.xlu0 %v1282_v63, %s2246_s10  ;;  %v1287_v63 = vsel %vm1027_vm7, %v1285_v4, %v1286_v12 }
 0x199   :  { %v1289_v44 = vsel %vm1027_vm7, %v1286_v12, %v1288_v10  ;;  %v1332_v13 = vsel %vm1027_vm7, %v1329_v24, %v1331_v37 }
 0x19a   :  { %v2751_v14 = vpop.permute.xlu1 %707  ;;  %v2753_v46 = vpop.permute.xlu0 %709 }
 0x19b   :  { %4167 = vst [vmem:[#allocation64_spill] sm:$0xff] %v2751_v14  ;;  %4168 = vst [vmem:[#allocation65_spill] sm:$0xff] %v2753_v46 }
 0x19c   :  { %1292 = vrot.lane.b32.xlu1 %v1284_v40, %s2246_s10  ;;  %1294 = vrot.lane.b32.xlu0 %v1283_v19, %s2246_s10  ;;  %v1328_v19 = vrot.slane %v1316_v20, 2  ;;  %v2777_v40 = vld [vmem:[#allocation2 + $0x18] sm:$0xff] }
 0x19d   :  { %v1319_v4 = vmul.f32 %v2777_v40, %v1315_v49 }
 0x19e   :  { %v2762_v56 = vpop.permute.xlu1 %711  ;;  %v2764_v45 = vpop.permute.xlu0 %749  ;;  %v1330_v12 = vsel %vm1027_vm7, %v1328_v19, %v1329_v24  ;;  %v1377_v24 = vrot.slane %v1365_v6, 2  ;;  %v1369_v6 = vmul.f32 %v2784_v60, %v1363_v47 }
 0x19f   :  { %4169 = vst [vmem:[#allocation66_spill] sm:$0xff] %v2762_v56  ;;  %4170 = vst [vmem:[#allocation67_spill] sm:$0xff] %v2764_v45  ;;  %v2781_v56 = vld [vmem:[#allocation2 + $0x20] sm:$0xff]  ;;  %v2914_v45 = vstv %s2848_s15 }
 0x1a0   :  { %1296 = vrot.lane.b32.xlu1 %v1287_v63, %s2246_s10  ;;  %1298 = vrot.lane.b32.xlu0 %v1289_v44, %s2246_s10  ;;  %v1320_v25 = vmul.f32 %v2781_v56, %v1315_v49  ;;  %v1321_v63 = vmul.f32 %v2784_v60, %v1315_v49 }
 0x1a2   :  { %v2773_v53 = vpop.permute.xlu1 %751  ;;  %v2775_v2 = vpop.permute.xlu0 %753  ;;  %v1334_v19 = vrot.slane %v1320_v25, 2  ;;  %v1336_v21 = vrot.slane %v1321_v63, 2  ;;  %v1366_v63 = vmul.f32 %v2768_v59, %v1363_v47 }
 0x1a3   :  { %4171 = vst [vmem:[#allocation68_spill] sm:$0xff] %v2773_v53  ;;  %4172 = vst [vmem:[#allocation69_spill] sm:$0xff] %v2775_v2  ;;  %v1333_v2 = vrot.slane %v1319_v4, 2  ;;  %v2890_v53 = vstv %s2827_s7 }
 0x1a4   :  { %1300 = vrot.lane.b32.xlu1 %v1288_v10, %s2246_s10  ;;  %1338 = vrot.lane.b32.xlu0 %v1330_v12, %s2246_s10  ;;  %v1364_v10 = vmul.f32 %v2759_v15, %v1363_v47  ;;  %v1337_v25 = vsel %vm1027_vm7, %v1334_v19, %v1336_v21 }
 0x1a5   :  { %v1335_v4 = vsel %vm1027_vm7, %v1333_v2, %v1334_v19  ;;  %v1368_v2 = vmul.f32 %v2781_v56, %v1363_v47 }
 0x1a6   :  { %v2789_v20 = vpop.permute.xlu1 %755  ;;  %v2791_v44 = vpop.permute.xlu0 %757 }
 0x1a7   :  { %4173 = vst [vmem:[#allocation70_spill] sm:$0xff] %v2789_v20  ;;  %4174 = vst [vmem:[#allocation71_spill] sm:$0xff] %v2791_v44  ;;  %v1379_v20 = vrot.slane %v1366_v63, 2 }
 0x1a8   :  { %1340 = vrot.lane.b32.xlu1 %v1332_v13, %s2246_s10  ;;  %1342 = vrot.lane.b32.xlu0 %v1331_v37, %s2246_s10  ;;  %v1376_v13 = vrot.slane %v1364_v10, 2 }
 0x1aa   :  { %v2800_v49 = vpop.permute.xlu1 %759  ;;  %v2802_v12 = vpop.permute.xlu0 %797 }
 0x1ab   :  { %4175 = vst [vmem:[#allocation72_spill] sm:$0xff] %v2800_v49  ;;  %4176 = vst [vmem:[#allocation73_spill] sm:$0xff] %v2802_v12  ;;  %v1367_v49 = vmul.f32 %v2777_v40, %v1363_v47  ;;  %v1378_v12 = vsel %vm1027_vm7, %v1376_v13, %v1377_v24  ;;  %v1411_v47 = vstv %s2156_s30 }
 0x1ac   :  { %1344 = vrot.lane.b32.xlu1 %v1335_v4, %s2246_s10  ;;  %1346 = vrot.lane.b32.xlu0 %v1337_v25, %s2246_s10  ;;  %v1382_v25 = vrot.slane %v1368_v2, 2  ;;  %v1413_v63 = vmul.f32 %v2794_v11, %v1411_v47  ;;  %v1416_v34 = vmul.f32 %v2781_v56, %v1411_v47  ;;  %v2887_v35 = vmul.f32 %v2784_v60, %v1411_v47 }
 0x1ad   :  { %v1381_v4 = vrot.slane %v1367_v49, 2  ;;  %v1412_v49 = vmul.f32 %v2759_v15, %v1411_v47 }
 0x1ae   :  { %v2809_v37 = vpop.permute.xlu1 %799  ;;  %v2811_v44 = vpop.permute.xlu0 %801  ;;  %v1430_v28 = vrot.slane %v1416_v34, 2  ;;  %v1432_v9 = vrot.slane %v2887_v35, 2 }
 0x1af   :  { %4177 = vst [vmem:[#allocation74_spill] sm:$0xff] %v2809_v37  ;;  %4178 = vst [vmem:[#allocation75_spill] sm:$0xff] %v2811_v44  ;;  %v2868_v44 = vstv %s2817_s3 }
 0x1b0   :  { %1348 = vrot.lane.b32.xlu1 %v1336_v21, %s2246_s10  ;;  %1386 = vrot.lane.b32.xlu0 %v1378_v12, %s2246_s10  ;;  %v1380_v21 = vsel %vm1027_vm7, %v1377_v24, %v1379_v20  ;;  %v1384_v12 = vrot.slane %v1369_v6, 2  ;;  %v1425_v6 = vrot.slane %v1413_v63, 2  ;;  %4183 = vst [vmem:[#allocation80_spill] sm:$0xff] %v2868_v44  ;;  %v2877_v63 = vstv %s2825_s5 }
 0x1b1   :  { %v2927_v7 = vmul.f32 %v2759_v15, %v2868_v44  ;;  %v2943_v35 = vmul.f32 %v2768_v59, %v2868_v44  ;;  %v2947_v34 = vmul.f32 %v2777_v40, %v2868_v44 }
 0x1b2   :  { %v2829_v19 = vpop.permute.xlu1 %803  ;;  %v2831_v10 = vpop.permute.xlu0 %805  ;;  %v1385_v2 = vsel %vm1027_vm7, %v1382_v25, %v1384_v12 }
 0x1b3   :  { %4179 = vst [vmem:[#allocation76_spill] sm:$0xff] %v2829_v19  ;;  %4180 = vst [vmem:[#allocation77_spill] sm:$0xff] %v2831_v10  ;;  %v1415_v19 = vmul.f32 %v2777_v40, %v1411_v47 }
 0x1b4   :  { %1388 = vrot.lane.b32.xlu1 %v1380_v21, %s2246_s10  ;;  %1390 = vrot.lane.b32.xlu0 %v1379_v20, %s2246_s10  ;;  %v1383_v20 = vsel %vm1027_vm7, %v1381_v4, %v1382_v25  ;;  %v1414_v21 = vmul.f32 %v2768_v59, %v1411_v47  ;;  %v2871_v4 = vstv %s2821_s4  ;;  %v2874_v25 = vstv %s2823_s1  ;;  %4189 = vst [vmem:[#allocation86_spill] sm:$0xff] %v2943_v35 }
 0x1b5   :  { %4184 = vst [vmem:[#allocation81_spill] sm:$0xff] %v2871_v4  ;;  %v1429_v27 = vrot.slane %v1415_v19, 2  ;;  %v2932_v19 = vstv %s2863_s18  ;;  %v2960_v46 = vmul.f32 %v2794_v11, %v2871_v4  ;;  %v2964_v35 = vmul.f32 %v2777_v40, %v2871_v4 }
 0x1b6   :  { %v2850_v24 = vpop.permute.xlu1 %807  ;;  %v2852_v13 = vpop.permute.xlu0 %845  ;;  %v2975_v61 = vmul.f32 %v2781_v56, %v2871_v4  ;;  %v3020_v23 = vmul.f32 %v2768_v59, %v2874_v25 }
 0x1b7   :  { %4181 = vst [vmem:[#allocation78_spill] sm:$0xff] %v2850_v24  ;;  %4182 = vst [vmem:[#allocation79_spill] sm:$0xff] %v2852_v13  ;;  %v1424_v24 = vrot.slane %v1412_v49, 2  ;;  %v1427_v49 = vrot.slane %v1414_v21, 2  ;;  %v2904_v21 = vstv %s2843_s12 }
 0x1b8   :  { %1392 = vrot.lane.b32.xlu1 %v1383_v20, %s2246_s10  ;;  %1394 = vrot.lane.b32.xlu0 %v1385_v2, %s2246_s10  ;;  %4191 = vst [vmem:[#allocation88_spill] sm:$0xff] %v2960_v46  ;;  %4192 = vst [vmem:[#allocation89_spill] sm:$0xff] %v2964_v35  ;;  %v2979_v46 = vmul.f32 %v2768_v59, %v2877_v63  ;;  %v478_v35 = vmul.f32 %v2781_v56, %v2877_v63 }
 0x1b9   :  { %v1426_v37 = vsel %vm1027_vm7, %v1424_v24, %v1425_v6  ;;  %v1459_v24 = vstv %s2837_s9  ;;  %v1428_v29 = vsel %vm1027_vm7, %v1425_v6, %v1427_v49  ;;  %v2939_v6 = vmul.f32 %v2794_v11, %v2868_v44  ;;  %4201 = vst [vmem:[#allocation98_spill] sm:$0xff] %v3020_v23 }
 0x1ba   :  { %v2879_v20 = vpop.permute.xlu1 %847  ;;  %v2881_v2 = vpop.permute.xlu0 %849  ;;  %v1461_v8 = vmul.f32 %v2794_v11, %v1459_v24  ;;  %v1462_v0 = vmul.f32 %v2768_v59, %v1459_v24  ;;  %4195 = vst [vmem:[#allocation92_spill] sm:$0xff] %v2979_v46  ;;  %v1464_v13 = vmul.f32 %v2781_v56, %v1459_v24  ;;  %v3016_v39 = vmul.f32 %v2784_v60, %v1459_v24 }
 0x1bb   :  { %4185 = vst [vmem:[#allocation82_spill] sm:$0xff] %v2879_v20  ;;  %4186 = vst [vmem:[#allocation83_spill] sm:$0xff] %v2881_v2  ;;  %v2901_v2 = vstv %s2841_s11  ;;  %v1431_v20 = vsel %vm1027_vm7, %v1429_v27, %v1430_v28  ;;  %v2986_v27 = vstv %s2897_s20  ;;  %v3034_v23 = vmul.f32 %v2759_v15, %v2890_v53 }
 0x1bc   :  { %1396 = vrot.lane.b32.xlu1 %v1384_v12, %s2246_s10  ;;  %1434 = vrot.lane.b32.xlu0 %v1426_v37, %s2247_s14  ;;  %v2917_v12 = vstv %s2854_s16  ;;  %v2920_v37 = vstv %s2856_s17  ;;  %v1473_v62 = vrot.slane %v1461_v8, 2  ;;  %4196 = vst [vmem:[#allocation93_spill] sm:$0xff] %v2986_v27  ;;  %v2990_v8 = vmul.f32 %v2784_v60, %v2871_v4 }
 0x1bd   :  { %v1463_v27 = vmul.f32 %v2777_v40, %v1459_v24  ;;  %v1480_v31 = vrot.slane %v3016_v39, 2  ;;  %v1509_v30 = vmul.f32 %v2794_v11, %v2901_v2 }
 0x1be   :  { %v2909_v47 = vpop.permute.xlu1 %851  ;;  %v2911_v3 = vpop.permute.xlu0 %853  ;;  %4197 = vst [vmem:[#allocation94_spill] sm:$0xff] %v2990_v8 }
 0x1bf   :  { %4187 = vst [vmem:[#allocation84_spill] sm:$0xff] %v2909_v47  ;;  %4188 = vst [vmem:[#allocation85_spill] sm:$0xff] %v2911_v3  ;;  %v2935_v3 = vstv %s2865_s19  ;;  %v2956_v47 = vmul.f32 %v2759_v15, %v2871_v4 }
 0x1c0   :  { %1436 = vrot.lane.b32.xlu1 %v1428_v29, %s2247_s14  ;;  %1438 = vrot.lane.b32.xlu0 %v1427_v49, %s2247_s14  ;;  %v1460_v29 = vmul.f32 %v2759_v15, %v1459_v24  ;;  %v2952_v49 = vmul.f32 %v2781_v56, %v2868_v44  ;;  %v1433_v44 = vsel %vm1027_vm7, %v1430_v28, %v1432_v9  ;;  %v493_v24 = vrot.slane %v478_v35, 1 }
 0x1c1   :  { %4190 = vst [vmem:[#allocation87_spill] sm:$0xff] %v2956_v47  ;;  %v2994_v28 = vmul.f32 %v2784_v60, %v2877_v63  ;;  %v3000_v47 = vmul.f32 %v2759_v15, %v2874_v25 }
 0x1c2   :  { %v2966_v14 = vpop.permute.xlu1 %855  ;;  %v2968_v5 = vpop.permute.xlu0 %893 }
 0x1c3   :  { %4193 = vst [vmem:[#allocation90_spill] sm:$0xff] %v2966_v14  ;;  %4194 = vst [vmem:[#allocation91_spill] sm:$0xff] %v2968_v5  ;;  %v475_v14 = vmul.f32 %v2794_v11, %v2877_v63  ;;  %v1472_v5 = vrot.slane %v1460_v29, 2  ;;  %v1475_v29 = vrot.slane %v1462_v0, 2  ;;  %v1478_v0 = vrot.slane %v1464_v13, 2 }
 0x1c4   :  { %1440 = vrot.lane.b32.xlu1 %v1431_v20, %s2247_s14  ;;  %1442 = vrot.lane.b32.xlu0 %v1433_v44, %s2247_s14  ;;  %4198 = vst [vmem:[#allocation95_spill] sm:$0xff] %v2994_v28  ;;  %v3004_v44 = vmul.f32 %v2794_v11, %v2874_v25  ;;  %v474_v20 = vmul.f32 %v2759_v15, %v2877_v63  ;;  %v523_v13 = vrot.slane %v3034_v23, 1 }
 0x1c5   :  { %v1474_v55 = vsel %vm1027_vm7, %v1472_v5, %v1473_v62  ;;  %v488_v33 = vrot.slane %v475_v14, 1  ;;  %v3029_v5 = vmul.f32 %v2777_v40, %v2874_v25  ;;  %v3038_v14 = vmul.f32 %v2781_v56, %v2874_v25 }
 0x1c6   :  { %v3008_v4 = vpop.permute.xlu1 %895  ;;  %v3010_v8 = vpop.permute.xlu0 %897  ;;  %v1476_v35 = vsel %vm1027_vm7, %v1473_v62, %v1475_v29  ;;  %v4209_v62 = vrot.slane %v2994_v28, 1  ;;  %v548_v23 = vmul.f32 %v2794_v11, %v2893_v57 }
 0x1c7   :  { %4199 = vst [vmem:[#allocation96_spill] sm:$0xff] %v3008_v4  ;;  %4200 = vst [vmem:[#allocation97_spill] sm:$0xff] %v3010_v8  ;;  %v477_v8 = vmul.f32 %v2777_v40, %v2877_v63  ;;  %v1477_v4 = vrot.slane %v1463_v27, 2  ;;  %v512_v27 = vmul.f32 %v2794_v11, %v2890_v53 }
 0x1c8   :  { %1444 = vrot.lane.b32.xlu1 %v1432_v9, %s2247_s14  ;;  %1482 = vrot.lane.b32.xlu0 %v1474_v55, %s2247_s14  ;;  %4202 = vst [vmem:[#allocation99_spill] sm:$0xff] %v3038_v14  ;;  %v3042_v9 = vmul.f32 %v2784_v60, %v2874_v25  ;;  %v487_v55 = vrot.slane %v474_v20, 1  ;;  %v4207_v25 = vrot.slane %v2979_v46, 1  ;;  %v3067_v39 = vsel %vm486_vm6, %v493_v24, %v4209_v62 }
 0x1c9   :  { %4210 = vst [vmem:[#allocation105_spill] sm:$0xff] %v3067_v39  ;;  %v1479_v28 = vsel %vm1027_vm7, %v1477_v4, %v1478_v0  ;;  %v1481_v46 = vsel %vm1027_vm7, %v1478_v0, %v1480_v31  ;;  %v1511_v0 = vmul.f32 %v2777_v40, %v2901_v2 }
 0x1ca   :  { %4203 = vst [vmem:[#allocation100_spill] sm:$0xff] %v3042_v9  ;;  %v3044_v63 = vpop.permute.xlu1 %899  ;;  %v3046_v54 = vpop.permute.xlu0 %901  ;;  %v3053_v10 = vsel %vm486_vm6, %v487_v55, %v488_v33  ;;  %v3058_v20 = vsel %vm486_vm6, %v488_v33, %v4207_v25  ;;  %v492_v9 = vrot.slane %v477_v8, 1  ;;  %v3072_v55 = vmul.f32 %v2768_v59, %v2890_v53 }
 0x1cb   :  { %4204 = vst [vmem:[#allocation101_spill] sm:$0xff] %v3044_v63  ;;  %4205 = vst [vmem:[#allocation102_spill] sm:$0xff] %v3046_v54  ;;  %v1508_v33 = vmul.f32 %v2759_v15, %v2901_v2  ;;  %v514_v8 = vmul.f32 %v2777_v40, %v2890_v53  ;;  %v1521_v54 = vrot.slane %v1509_v30, 2  ;;  %v1510_v63 = vmul.f32 %v2768_v59, %v2901_v2 }
 0x1cc   :  { %4206 = vst [vmem:[#allocation103_spill] sm:$0xff] %v3053_v10  ;;  %4208 = vst [vmem:[#allocation104_spill] sm:$0xff] %v3058_v20  ;;  %1484 = vrot.lane.b32.xlu1 %v1476_v35, %s2247_s14  ;;  %1486 = vrot.lane.b32.xlu0 %v1475_v29, %s2247_s14  ;;  %v515_v29 = vmul.f32 %v2781_v56, %v2890_v53  ;;  %v3082_v35 = vmul.f32 %v2784_v60, %v2890_v53  ;;  %v524_v53 = vrot.slane %v512_v27, 1 }
 0x1cd   :  { %4211 = vst [vmem:[#allocation106_spill] sm:$0xff] %v3072_v55  ;;  %v3095_v39 = vsel %vm486_vm6, %v492_v9, %v493_v24  ;;  %v547_v20 = vmul.f32 %v2759_v15, %v2893_v57  ;;  %v1520_v4 = vrot.slane %v1508_v33, 2  ;;  %v1512_v24 = vmul.f32 %v2781_v56, %v2901_v2 }
 0x1ce   :  { %4212 = vst [vmem:[#allocation107_spill] sm:$0xff] %v3082_v35  ;;  %v3086_v25 = vpop.permute.xlu1 %903  ;;  %v3088_v62 = vpop.permute.xlu0 %941  ;;  %4215 = vst [vmem:[#allocation110_spill] sm:$0xff] %v3095_v39  ;;  %v528_v9 = vrot.slane %v514_v8, 1  ;;  %v529_v27 = vrot.slane %v515_v29, 1  ;;  %v560_v39 = vrot.slane %v548_v23, 1  ;;  %v1523_v33 = vrot.slane %v1510_v63, 2 }
 0x1cf   :  { %4213 = vst [vmem:[#allocation108_spill] sm:$0xff] %v3086_v25  ;;  %4214 = vst [vmem:[#allocation109_spill] sm:$0xff] %v3088_v62  ;;  %v3101_v25 = vmul.f32 %v2768_v59, %v2893_v57  ;;  %v3120_v30 = vmul.f32 %v2784_v60, %v2901_v2  ;;  %v559_v8 = vrot.slane %v547_v20, 1  ;;  %v551_v23 = vmul.f32 %v2781_v56, %v2893_v57 }
 0x1d0   :  { %1488 = vrot.lane.b32.xlu1 %v1479_v28, %s2247_s14  ;;  %1490 = vrot.lane.b32.xlu0 %v1481_v46, %s2247_s14  ;;  %v550_v46 = vmul.f32 %v2777_v40, %v2893_v57  ;;  %v1522_v28 = vsel %vm1027_vm7, %v1520_v4, %v1521_v54  ;;  %v3127_v62 = vmul.f32 %v2784_v60, %v2893_v57  ;;  %v1525_v4 = vrot.slane %v1511_v0, 2 }
 0x1d1   :  { %4216 = vst [vmem:[#allocation111_spill] sm:$0xff] %v3101_v25  ;;  %v1526_v63 = vrot.slane %v1512_v24, 2  ;;  %v1665_v2 = vmul.f32 %v2759_v15, %v2904_v21  ;;  %v1666_v20 = vmul.f32 %v2794_v11, %v2904_v21  ;;  %v3136_v29 = vsel %vm486_vm6, %v523_v13, %v524_v53 }
 0x1d2   :  { %v3111_v10 = vpop.permute.xlu1 %943  ;;  %v3113_v22 = vpop.permute.xlu0 %945  ;;  %4219 = vst [vmem:[#allocation114_spill] sm:$0xff] %v3127_v62  ;;  %4220 = vst [vmem:[#allocation115_spill] sm:$0xff] %v3136_v29  ;;  %v4224_v0 = vrot.slane %v3082_v35, 1  ;;  %v3156_v13 = vsel %vm486_vm6, %v559_v8, %v560_v39  ;;  %v564_v29 = vrot.slane %v550_v46, 1  ;;  %v565_v35 = vrot.slane %v551_v23, 1 }
 0x1d3   :  { %4217 = vst [vmem:[#allocation112_spill] sm:$0xff] %v3111_v10  ;;  %4218 = vst [vmem:[#allocation113_spill] sm:$0xff] %v3113_v22  ;;  %v4221_v22 = vrot.slane %v3072_v55, 1  ;;  %v1524_v55 = vsel %vm1027_vm7, %v1521_v54, %v1523_v33  ;;  %v1667_v8 = vmul.f32 %v2768_v59, %v2904_v21  ;;  %v1527_v46 = vsel %vm1027_vm7, %v1525_v4, %v1526_v63 }
 0x1d4   :  { %1492 = vrot.lane.b32.xlu1 %v1480_v31, %s2247_s14  ;;  %1530 = vrot.lane.b32.xlu0 %v1522_v28, %s2247_s14  ;;  %v3144_v31 = vsel %vm486_vm6, %v528_v9, %v529_v27  ;;  %v3149_v24 = vsel %vm486_vm6, %v529_v27, %v4224_v0  ;;  %4227 = vst [vmem:[#allocation120_spill] sm:$0xff] %v3156_v13  ;;  %v1677_v54 = vrot.slane %v1665_v2, 3  ;;  %v1678_v0 = vrot.slane %v1666_v20, 3 }
 0x1d5   :  { %v3141_v57 = vsel %vm486_vm6, %v524_v53, %v4221_v22  ;;  %4223 = vst [vmem:[#allocation117_spill] sm:$0xff] %v3144_v31  ;;  %v1528_v22 = vrot.slane %v3120_v30, 2  ;;  %v4228_v53 = vrot.slane %v3101_v25, 1  ;;  %v1016_v30 = vmul.f32 %v2794_v11, %v2907_v50 }
 0x1d6   :  { %4222 = vst [vmem:[#allocation116_spill] sm:$0xff] %v3141_v57  ;;  %v3151_v28 = vpop.permute.xlu1 %947  ;;  %v3153_v10 = vpop.permute.xlu0 %949  ;;  %v1668_v23 = vmul.f32 %v2777_v40, %v2904_v21  ;;  %v3187_v4 = vmul.f32 %v2768_v59, %v2907_v50  ;;  %v1714_v20 = vmul.f32 %v2794_v11, %v2914_v45  ;;  %v1019_v27 = vmul.f32 %v2781_v56, %v2907_v50 }
 0x1d7   :  { %4225 = vst [vmem:[#allocation118_spill] sm:$0xff] %v3151_v28  ;;  %4226 = vst [vmem:[#allocation119_spill] sm:$0xff] %v3153_v10  ;;  %v3163_v9 = vsel %vm486_vm6, %v560_v39, %v4228_v53  ;;  %v1529_v2 = vsel %vm1027_vm7, %v1526_v63, %v1528_v22  ;;  %v1018_v53 = vmul.f32 %v2777_v40, %v2907_v50  ;;  %v1029_v57 = vrot.slane %v1016_v30, 2 }
 0x1d8   :  { %4229 = vst [vmem:[#allocation121_spill] sm:$0xff] %v3163_v9  ;;  %1532 = vrot.lane.b32.xlu1 %v1524_v55, %s2247_s14  ;;  %1534 = vrot.lane.b32.xlu0 %v1523_v33, %s2247_s14  ;;  %v1669_v55 = vmul.f32 %v2781_v56, %v2904_v21  ;;  %v3183_v33 = vmul.f32 %v2784_v60, %v2904_v21  ;;  %4232 = vst [vmem:[#allocation124_spill] sm:$0xff] %v3187_v4  ;;  %v1680_v21 = vrot.slane %v1667_v8, 3 }
 0x1d9   :  { %v1015_v63 = vmul.f32 %v2759_v15, %v2907_v50  ;;  %v3205_v28 = vmul.f32 %v2784_v60, %v2907_v50  ;;  %v1679_v31 = vsel %vm1568_vm8, %v1677_v54, %v1678_v0  ;;  %v1726_v10 = vrot.slane %v1714_v20, 3 }
 0x1da   :  { %v3173_v25 = vpop.permute.xlu1 %951  ;;  %v3175_v39 = vpop.permute.xlu0 %989  ;;  %v1033_v54 = vrot.slane %v1018_v53, 2  ;;  %v1034_v30 = vrot.slane %v1019_v27, 2  ;;  %v3224_v13 = vmul.f32 %v2794_v11, %v2917_v12  ;;  %v4237_v42 = vrot.slane %v3127_v62, 1 }
 0x1db   :  { %4230 = vst [vmem:[#allocation122_spill] sm:$0xff] %v3173_v25  ;;  %4231 = vst [vmem:[#allocation123_spill] sm:$0xff] %v3175_v39  ;;  %v3197_v25 = vsel %vm486_vm6, %v564_v29, %v565_v35  ;;  %v1713_v29 = vmul.f32 %v2759_v15, %v2914_v45  ;;  %v1683_v39 = vrot.slane %v1669_v55, 3  ;;  %v1028_v55 = vrot.slane %v1015_v63, 2 }
 0x1dc   :  { %4233 = vst [vmem:[#allocation125_spill] sm:$0xff] %v3197_v25  ;;  %1536 = vrot.lane.b32.xlu1 %v1527_v46, %s2247_s14  ;;  %1538 = vrot.lane.b32.xlu0 %v1529_v2, %s2247_s14  ;;  %4234 = vst [vmem:[#allocation126_spill] sm:$0xff] %v3205_v28  ;;  %v3214_v46 = vmul.f32 %v2768_v59, %v2914_v45  ;;  %v1682_v25 = vrot.slane %v1668_v23, 3  ;;  %v3229_v14 = vsel %vm486_vm6, %v565_v35, %v4237_v42 }
 0x1dd   :  { %4236 = vst [vmem:[#allocation128_spill] sm:$0xff] %v3224_v13  ;;  %v1681_v23 = vsel %vm1568_vm8, %v1678_v0, %v1680_v21  ;;  %v1725_v53 = vrot.slane %v1713_v29, 3  ;;  %v1052_v9 = vmul.f32 %v2759_v15, %v2917_v12  ;;  %v1716_v50 = vmul.f32 %v2777_v40, %v2914_v45 }
 0x1de   :  { %v3216_v8 = vpop.permute.xlu1 %991  ;;  %v3218_v2 = vpop.permute.xlu0 %993  ;;  %v4238_v0 = vrot.slane %v3183_v33, 3  ;;  %v4239_v29 = vrot.slane %v3187_v4, 2  ;;  %v3258_v62 = vsel %vm1027_vm7, %v1033_v54, %v1034_v30  ;;  %v1762_v54 = vmul.f32 %v2794_v11, %v2920_v37 }
 0x1df   :  { %4235 = vst [vmem:[#allocation127_spill] sm:$0xff] %v3218_v2  ;;  %v1727_v20 = vsel %vm1568_vm8, %v1725_v53, %v1726_v10  ;;  %4240 = vst [vmem:[#allocation129_spill] sm:$0xff] %v3258_v62  ;;  %v3277_v53 = vstv %s3207_s21  ;;  %v3284_v2 = vmul.f32 %v2768_v59, %v2917_v12 }
 0x1e0   :  { %1540 = vrot.lane.b32.xlu1 %v1528_v22, %s2247_s14  ;;  %1687 = vrot.lane.b32.xlu0 %v1679_v31, %s2245_s6  ;;  %v3245_v31 = vsel %vm1027_vm7, %v1028_v55, %v1029_v57  ;;  %v1684_v22 = vsel %vm1568_vm8, %v1682_v25, %v1683_v39  ;;  %v1686_v63 = vsel %vm1568_vm8, %v1683_v39, %v4238_v0  ;;  %v4241_v25 = vrot.slane %v3205_v28, 2 }
 0x1e1   :  { %v3254_v27 = vsel %vm1027_vm7, %v1029_v57, %v4239_v29  ;;  %v1717_v55 = vmul.f32 %v2781_v56, %v2914_v45  ;;  %v3272_v57 = vmul.f32 %v2784_v60, %v2914_v45  ;;  %4243 = vst [vmem:[#allocation131_spill] sm:$0xff] %v3277_v53  ;;  %v4244_v0 = vrot.slane %v3214_v46, 3 }
 0x1e2   :  { %v3240_v42 = vpop.permute.xlu1 %995  ;;  %v3242_v35 = vpop.permute.xlu0 %997  ;;  %v3268_v39 = vsel %vm1027_vm7, %v1034_v30, %v4241_v25  ;;  %v1064_v29 = vrot.slane %v1052_v9, 2  ;;  %v1761_v45 = vmul.f32 %v2759_v15, %v2920_v37  ;;  %v3294_v28 = vmul.f32 %v2781_v56, %v2917_v12 }
 0x1e3   :  { %4242 = vst [vmem:[#allocation130_spill] sm:$0xff] %v3268_v39  ;;  %v3302_v9 = vmul.f32 %v2768_v59, %v2920_v37  ;;  %v3313_v53 = vmul.f32 %v2794_v11, %v2932_v19  ;;  %v1774_v62 = vrot.slane %v1762_v54, 3 }
 0x1e4   :  { %1689 = vrot.lane.b32.xlu1 %v1681_v23, %s2245_s6  ;;  %1691 = vrot.lane.b32.xlu0 %v1680_v21, %s2245_s6  ;;  %v1729_v23 = vsel %vm1568_vm8, %v1726_v10, %v4244_v0  ;;  %v1730_v21 = vrot.slane %v1716_v50, 3  ;;  %v3298_v10 = vmul.f32 %v2784_v60, %v2917_v12  ;;  %v204_v50 = vadd.f32 %v2473_v16, %v2975_v61 }
 0x1e5   :  { %v4246_v0 = vrot.slane %v3224_v13, 2  ;;  %v3320_v61 = vmul.f32 %v2777_v40, %v2917_v12  ;;  %v1088_v16 = vmul.f32 %v2759_v15, %v2932_v19  ;;  %v1773_v12 = vrot.slane %v1761_v45, 3 }
 0x1e6   :  { %v3286_v30 = vpop.permute.xlu1 %999  ;;  %v3288_v25 = vpop.permute.xlu0 %1146  ;;  %v1101_v13 = vrot.slane %v3313_v53, 2  ;;  %v4251_v45 = vrot.slane %v3272_v57, 3 }
 0x1e7   :  { %4245 = vst [vmem:[#allocation132_spill] sm:$0xff] %v3286_v30  ;;  %v3309_v4 = vsel %vm1027_vm7, %v1064_v29, %v4246_v0  ;;  %v1731_v30 = vrot.slane %v1717_v55, 3  ;;  %4248 = vst [vmem:[#allocation134_spill] sm:$0xff] %v3320_v61  ;;  %v3326_v55 = vadd.f32 %v2425_v36, %v2927_v7  ;;  %v318_v29 = vadd.f32 %v2557_v48, %v204_v50 }
 0x1e8   :  { %4247 = vst [vmem:[#allocation133_spill] sm:$0xff] %v3309_v4  ;;  %1693 = vrot.lane.b32.xlu1 %v1684_v22, %s2245_s6  ;;  %1695 = vrot.lane.b32.xlu0 %v1686_v63, %s2245_s6  ;;  %v1764_v22 = vmul.f32 %v2777_v40, %v2920_v37  ;;  %v1765_v63 = vmul.f32 %v2781_v56, %v2920_v37  ;;  %v4250_v4 = vrot.slane %v3183_v33, 3  ;;  %v1100_v61 = vrot.slane %v1088_v16, 2 }
 0x1e9   :  { %v238_v7 = vadd.f32 %v2482_v26, %v3000_v47  ;;  %v432_v48 = vadd.f32 %v2641_v38, %v318_v29  ;;  %v1732_v50 = vsel %vm1568_vm8, %v1730_v21, %v1731_v30  ;;  %v1734_v39 = vsel %vm1568_vm8, %v1731_v30, %v4251_v45  ;;  %v4258_v45 = vld [vmem:[#allocation17_spill] sm:$0xff] }
 0x1ea   :  { %v3333_v54 = vpop.permute.xlu1 %1148  ;;  %v3335_v0 = vpop.permute.xlu0 %1150  ;;  %v1775_v36 = vsel %vm1568_vm8, %v1773_v12, %v1774_v62  ;;  %v3355_v26 = vmul.f32 %v2784_v60, %v2920_v37  ;;  %v1778_v47 = vrot.slane %v1764_v22, 3  ;;  %v1779_v53 = vrot.slane %v1765_v63, 3 }
 0x1eb   :  { %4249 = vst [vmem:[#allocation135_spill] sm:$0xff] %v3335_v0  ;;  %v352_v38 = vadd.f32 %v2566_v1, %v238_v7  ;;  %v3360_v33 = vmul.f32 %v2768_v59, %v2932_v19  ;;  %v4252_v30 = vrot.slane %v3298_v10, 2  ;;  %v4253_v37 = vrot.slane %v3294_v28, 2  ;;  %v4271_v0 = vld [vmem:[#allocation34_spill] sm:$0xff] }
 0x1ec   :  { %1697 = vrot.lane.b32.xlu1 %v4250_v4, %s2245_s6  ;;  %1735 = vrot.lane.b32.xlu0 %v1727_v20, %s2245_s6  ;;  %v163_v4 = vadd.f32 %v2432_v43, %v2939_v6  ;;  %v4254_v1 = vrot.slane %v3302_v9, 3  ;;  %v1809_v22 = vmul.f32 %v2759_v15, %v2935_v3  ;;  %v239_v43 = vadd.f32 %v2489_v32, %v3004_v44 }
 0x1ed   :  { %v1073_v16 = vsel %vm1027_vm7, %v4253_v37, %v4252_v30  ;;  %v466_v6 = vadd.f32 %v2650_v17, %v352_v38  ;;  %v543_v63 = vadd.f32 %v3149_v24, %v432_v48  ;;  %v3385_v12 = vsel %vm1027_vm7, %v1100_v61, %v1101_v13  ;;  %v4260_v37 = vld [vmem:[#allocation120_spill] sm:$0xff] }
 0x1ee   :  { %v3364_v20 = vpop.permute.xlu1 %1152  ;;  %v3366_v21 = vpop.permute.xlu0 %1154  ;;  %v3376_v29 = vsel %vm1568_vm8, %v1774_v62, %v4254_v1  ;;  %v3389_v7 = vadd.f32 %v2443_v51, %v2947_v34  ;;  %v3393_v62 = vadd.f32 %v2445_v52, %v2952_v49  ;;  %v4255_v32 = vrot.slane %v3214_v46, 3 }
 0x1ef   :  { %v4110_v17 = vrot.slane %v3355_v26, 3  ;;  %v3402_v44 = vmul.f32 %v2794_v11, %v2935_v3  ;;  %v353_v24 = vadd.f32 %v2573_v18, %v239_v43  ;;  %v675_v51 = vadd.f32 %v2725_v58, %v543_v63  ;;  %v4257_v58 = vld [vmem:[#allocation99_spill] sm:$0xff]  ;;  %v4261_v43 = vld [vmem:[#allocation77_spill] sm:$0xff] }
 0x1f0   :  { %1737 = vrot.lane.b32.xlu1 %v1729_v23, %s2245_s6  ;;  %1739 = vrot.lane.b32.xlu0 %v4255_v32, %s2245_s6  ;;  %v3407_v34 = vsel %vm1568_vm8, %v1778_v47, %v1779_v53  ;;  %v4111_v52 = vrot.slane %v3360_v33, 2  ;;  %v241_v49 = vadd.f32 %v2499_v41, %v3029_v5  ;;  %v1821_v61 = vrot.slane %v1809_v22, 3  ;;  %v4259_v47 = vld [vmem:[#allocation45_spill] sm:$0xff] }
 0x1f1   :  { %v1091_v48 = vmul.f32 %v2777_v40, %v2932_v19  ;;  %v1092_v18 = vmul.f32 %v2781_v56, %v2932_v19  ;;  %v242_v38 = vadd.f32 %v4258_v45, %v4257_v58  ;;  %v467_v30 = vadd.f32 %v4259_v47, %v353_v24  ;;  %v4264_v58 = vld [vmem:[#allocation61_spill] sm:$0xff]  ;;  %v4265_v45 = vld [vmem:[#allocation119_spill] sm:$0xff] }
 0x1f2   :  { %v3412_v46 = vpop.permute.xlu1 %1156  ;;  %v3414_v23 = vpop.permute.xlu0 %1194  ;;  %v575_v1 = vadd.f32 %v4260_v37, %v466_v6  ;;  %v819_v41 = vadd.f32 %v4261_v43, %v675_v51  ;;  %v1782_v5 = vsel %vm1568_vm8, %v1779_v53, %v4110_v17  ;;  %v3433_v63 = vmul.f32 %v2784_v60, %v2932_v19  ;;  %v4262_v6 = vld [vmem:[#allocation31_spill] sm:$0xff]  ;;  %v4263_v51 = vld [vmem:[#allocation32_spill] sm:$0xff] }
 0x1f3   :  { %4256 = vst [vmem:[#allocation136_spill] sm:$0xff] %v3412_v46  ;;  %v3437_v32 = vmul.f32 %v2768_v59, %v2935_v3  ;;  %v355_v24 = vadd.f32 %v4262_v6, %v241_v49  ;;  %v4266_v53 = vld [vmem:[#allocation19_spill] sm:$0xff]  ;;  %v1104_v19 = vsel %vm1027_vm7, %v1101_v13, %v4111_v52  ;;  %v1105_v22 = vrot.slane %v1091_v48, 2 }
 0x1f4   :  { %1741 = vrot.lane.b32.xlu1 %v1732_v50, %s2245_s6  ;;  %1743 = vrot.lane.b32.xlu0 %v1734_v39, %s2245_s6  ;;  %v356_v50 = vadd.f32 %v4263_v51, %v242_v38  ;;  %v719_v39 = vadd.f32 %v4264_v58, %v575_v1  ;;  %v963_v47 = vadd.f32 %v4265_v45, %v819_v41  ;;  %v1106_v46 = vrot.slane %v1092_v18, 2  ;;  %v4267_v49 = vld [vmem:[#allocation47_spill] sm:$0xff]  ;;  %v4268_v38 = vld [vmem:[#allocation48_spill] sm:$0xff]  ;;  %v4269_v1 = vld [vmem:[#allocation121_spill] sm:$0xff] }
 0x1f5   :  { %v276_v37 = vadd.f32 %v4266_v53, %v3326_v55  ;;  %v469_v6 = vadd.f32 %v4267_v49, %v355_v24  ;;  %v576_v58 = vadd.f32 %v4269_v1, %v467_v30  ;;  %v4270_v41 = vld [vmem:[#allocation79_spill] sm:$0xff]  ;;  %v4272_v53 = vrot.slane %v3272_v57, 3  ;;  %v4278_v1 = vld [vmem:[#allocation20_spill] sm:$0xff] }
 0x1f6   :  { %v3445_v43 = vpop.permute.xlu1 %1196  ;;  %v3447_v17 = vpop.permute.xlu0 %1198  ;;  %v470_v51 = vadd.f32 %v4268_v38, %v356_v50  ;;  %v863_v45 = vadd.f32 %v4270_v41, %v719_v39  ;;  %v4273_v13 = vrot.slane %v3402_v44, 3  ;;  %v1108_v18 = vrot.slane %v3433_v63, 2  ;;  %v4274_v30 = vld [vmem:[#allocation87_spill] sm:$0xff] }
 0x1f7   :  { %v390_v55 = vadd.f32 %v4271_v0, %v276_v37  ;;  %v3467_v24 = vmul.f32 %v2777_v40, %v2935_v3  ;;  %v4275_v50 = vld [vmem:[#allocation11_spill] sm:$0xff]  ;;  %v4276_v0 = vld [vmem:[#allocation62_spill] sm:$0xff]  ;;  %v1084_v38 = vadd.f32 %v1073_v16, %v963_v47  ;;  %v3483_v52 = vmul.f32 %v2784_v60, %v2935_v3 }
 0x1f8   :  { %1745 = vrot.lane.b32.xlu1 %v4272_v53, %s2245_s6  ;;  %1783 = vrot.lane.b32.xlu0 %v1775_v36, %s2245_s6  ;;  %v1823_v48 = vsel %vm1568_vm8, %v1821_v61, %v4273_v13  ;;  %v200_v39 = vadd.f32 %v4275_v50, %v4274_v30  ;;  %v720_v37 = vadd.f32 %v4276_v0, %v576_v58  ;;  %v4277_v49 = vld [vmem:[#allocation123_spill] sm:$0xff]  ;;  %v4279_v30 = vld [vmem:[#allocation125_spill] sm:$0xff]  ;;  %v4280_v16 = vld [vmem:[#allocation82_spill] sm:$0xff] }
 0x1f9   :  { %v1007_v57 = vadd.f32 %v4277_v49, %v863_v45  ;;  %v277_v36 = vadd.f32 %v4278_v1, %v163_v4  ;;  %v1107_v61 = vsel %vm1027_vm7, %v1105_v22, %v1106_v46  ;;  %v3479_v13 = vmul.f32 %v2781_v56, %v2935_v3  ;;  %v4281_v50 = vld [vmem:[#allocation35_spill] sm:$0xff] }
 0x1fa   :  { %v3474_v41 = vpop.permute.xlu1 %1200  ;;  %v1203_v53 = vpop.permute.xlu0 %1202  ;;  %v578_v58 = vadd.f32 %v4279_v30, %v469_v6  ;;  %v579_v45 = vadd.f32 %v3229_v14, %v470_v51  ;;  %v864_v47 = vadd.f32 %v4280_v16, %v720_v37  ;;  %v4282_v49 = vld [vmem:[#allocation103_spill] sm:$0xff]  ;;  %v4283_v1 = vrot.slane %v3302_v9, 3  ;;  %v4284_v6 = vld [vmem:[#allocation64_spill] sm:$0xff]  ;;  %v4285_v37 = vld [vmem:[#allocation65_spill] sm:$0xff] }
 0x1fb   :  { %v3488_v4 = vadd.f32 %v1203_v53, %v1084_v38  ;;  %v391_v0 = vadd.f32 %v4281_v50, %v277_v36  ;;  %v503_v22 = vadd.f32 %v4282_v49, %v390_v55  ;;  %v1109_v3 = vsel %vm1027_vm7, %v1106_v46, %v1108_v18  ;;  %v4287_v9 = vld [vmem:[#allocation23_spill] sm:$0xff]  ;;  %v4288_v46 = vld [vmem:[#allocation93_spill] sm:$0xff] }
 0x1fc   :  { %1785 = vrot.lane.b32.xlu1 %v3376_v29, %s2245_s6  ;;  %1787 = vrot.lane.b32.xlu0 %v4283_v1, %s2245_s6  ;;  %v1824_v14 = vrot.slane %v3437_v32, 3  ;;  %v722_v51 = vadd.f32 %v4284_v6, %v578_v58  ;;  %v723_v38 = vadd.f32 %v4285_v37, %v579_v45  ;;  %v1008_v36 = vadd.f32 %v3216_v8, %v864_v47  ;;  %v4286_v29 = vld [vmem:[#allocation22_spill] sm:$0xff]  ;;  %v4289_v8 = vld [vmem:[#allocation52_spill] sm:$0xff]  ;;  %v4291_v47 = vld [vmem:[#allocation85_spill] sm:$0xff] }
 0x1fd   :  { %v1116_v55 = vadd.f32 %v3385_v12, %v1007_v57  ;;  %v279_v53 = vadd.f32 %v4286_v29, %v3389_v7  ;;  %v280_v30 = vadd.f32 %v4287_v9, %v3393_v62  ;;  %v3513_v32 = vmul.f32 %v2759_v15, %v4288_v46  ;;  %v4290_v12 = vld [vmem:[#allocation84_spill] sm:$0xff]  ;;  %v4292_v62 = vld [vmem:[#allocation37_spill] sm:$0xff]  ;;  %v4293_v6 = vld [vmem:[#allocation38_spill] sm:$0xff] }
 0x1fe   :  { %v3509_v16 = vpop.permute.xlu1 %1204  ;;  %v1243_v50 = vpop.permute.xlu0 %1242  ;;  %v3517_v58 = vmul.f32 %v2794_v11, %v4288_v46  ;;  %v623_v45 = vadd.f32 %v4289_v8, %v503_v22  ;;  %v866_v57 = vadd.f32 %v4290_v12, %v722_v51  ;;  %v867_v7 = vadd.f32 %v4291_v47, %v723_v38  ;;  %v4294_v29 = vld [vmem:[#allocation104_spill] sm:$0xff]  ;;  %v4295_v22 = vld [vmem:[#allocation67_spill] sm:$0xff] }
 0x1ff   :  { %v3522_v49 = vadd.f32 %v1243_v50, %v1116_v55  ;;  %v393_v1 = vadd.f32 %v4292_v62, %v279_v53  ;;  %v394_v37 = vadd.f32 %v4293_v6, %v280_v30  ;;  %v504_v9 = vadd.f32 %v4294_v29, %v391_v0  ;;  %v4296_v50 = vld [vmem:[#allocation25_spill] sm:$0xff]  ;;  %v4304_v29 = vld [vmem:[#allocation110_spill] sm:$0xff] }
 0x200   :  { %1789 = vrot.lane.b32.xlu1 %v3407_v34, %s2245_s6  ;;  %1791 = vrot.lane.b32.xlu0 %v1782_v5, %s2245_s6  ;;  %v1826_v15 = vrot.slane %v3467_v24, 3  ;;  %v767_v8 = vadd.f32 %v4295_v22, %v623_v45  ;;  %v1010_v51 = vadd.f32 %v3240_v42, %v866_v57  ;;  %v1011_v38 = vadd.f32 %v3242_v35, %v867_v7  ;;  %v4298_v45 = vld [vmem:[#allocation88_spill] sm:$0xff]  ;;  %v4300_v35 = vld [vmem:[#allocation53_spill] sm:$0xff] }
 0x201   :  { %v1117_v55 = vadd.f32 %v1104_v19, %v1008_v36  ;;  %v314_v53 = vadd.f32 %v4296_v50, %v200_v39  ;;  %v4297_v0 = vrot.slane %v3402_v44, 3  ;;  %v1827_v5 = vrot.slane %v3479_v13, 3  ;;  %v4299_v42 = vld [vmem:[#allocation12_spill] sm:$0xff]  ;;  %v4301_v36 = vld [vmem:[#allocation91_spill] sm:$0xff]  ;;  %v4303_v44 = vld [vmem:[#allocation105_spill] sm:$0xff] }
 0x202   :  { %v1245_v12 = vpop.permute.xlu1 %1244  ;;  %v3535_v30 = vpop.permute.xlu0 %1246  ;;  %v3543_v24 = vmul.f32 %v2768_v59, %v4288_v46  ;;  %v201_v57 = vadd.f32 %v4299_v42, %v4298_v45  ;;  %v624_v19 = vadd.f32 %v4300_v35, %v504_v9  ;;  %v911_v39 = vadd.f32 %v4301_v36, %v767_v8  ;;  %v4302_v7 = vld [vmem:[#allocation40_spill] sm:$0xff]  ;;  %v4308_v45 = vld [vmem:[#allocation54_spill] sm:$0xff]  ;;  %v4309_v42 = vld [vmem:[#allocation55_spill] sm:$0xff] }
 0x203   :  { %v1825_v34 = vsel %vm1568_vm8, %v4297_v0, %v1824_v14  ;;  %v3549_v47 = vadd.f32 %v1245_v12, %v1117_v55  ;;  %v428_v62 = vadd.f32 %v4302_v7, %v314_v53  ;;  %v507_v6 = vadd.f32 %v4303_v44, %v394_v37  ;;  %v4306_v50 = vld [vmem:[#allocation68_spill] sm:$0xff]  ;;  %v4307_v12 = vld [vmem:[#allocation26_spill] sm:$0xff] }
 0x204   :  { %v506_v22 = vadd.f32 %v4304_v29, %v393_v1  ;;  %v4305_v13 = vrot.slane %v3355_v26, 3  ;;  %1831 = vrot.lane.b32.xlu0 %v1823_v48, %s2246_s10  ;;  %v1829_v59 = vrot.slane %v3483_v52, 3  ;;  %v768_v9 = vadd.f32 %v4306_v50, %v624_v19  ;;  %v4310_v7 = vld [vmem:[#allocation96_spill] sm:$0xff]  ;;  %v4314_v19 = vld [vmem:[#allocation115_spill] sm:$0xff]  ;;  %v4315_v29 = vld [vmem:[#allocation70_spill] sm:$0xff] }
 0x205   :  { %v1119_v0 = vadd.f32 %v1107_v61, %v1010_v51  ;;  %v1120_v8 = vadd.f32 %v1109_v3, %v1011_v38  ;;  %v1869_v55 = vrot.slane %v3513_v32, 3  ;;  %v315_v53 = vadd.f32 %v4307_v12, %v201_v57  ;;  %v4311_v3 = vld [vmem:[#allocation89_spill] sm:$0xff]  ;;  %v4312_v32 = vld [vmem:[#allocation14_spill] sm:$0xff] }
 0x206   :  { %1793 = vrot.lane.b32.xlu1 %v4305_v13, %s2245_s6  ;;  %v627_v37 = vadd.f32 %v4308_v45, %v507_v6  ;;  %v626_v1 = vadd.f32 %v4309_v42, %v506_v22  ;;  %v1249_v35 = vpop.permute.xlu1 %1248  ;;  %v1251_v36 = vpop.permute.xlu0 %1250  ;;  %v1828_v26 = vsel %vm1568_vm8, %v1826_v15, %v1827_v5  ;;  %v912_v48 = vadd.f32 %v4310_v7, %v768_v9  ;;  %v4313_v38 = vld [vmem:[#allocation41_spill] sm:$0xff]  ;;  %v4317_v9 = vld [vmem:[#allocation28_spill] sm:$0xff]  ;;  %v4323_v7 = vld [vmem:[#allocation43_spill] sm:$0xff]  ;;  %s3661_s6 = sld [smem:[#allocation3]] }
 0x207   :  { %v1044_v52 = vadd.f32 %v3245_v31, %v911_v39  ;;  %v3567_v44 = vadd.f32 %v1249_v35, %v1119_v0  ;;  %v3569_v61 = vadd.f32 %v1251_v36, %v1120_v8  ;;  %v203_v51 = vadd.f32 %v4312_v32, %v4311_v3  ;;  %v4316_v31 = vld [vmem:[#allocation71_spill] sm:$0xff]  ;;  %v4318_v8 = vld [vmem:[#allocation56_spill] sm:$0xff] }
 0x208   :  { %v429_v57 = vadd.f32 %v4313_v38, %v315_v53  ;;  %v539_v6 = vadd.f32 %v4314_v19, %v428_v62  ;;  %1835 = vrot.lane.b32.xlu0 %v1824_v14, %s2246_s10  ;;  %v1870_v15 = vrot.slane %v3517_v58, 3  ;;  %v770_v22 = vadd.f32 %v4315_v29, %v626_v1  ;;  %v4319_v58 = vld [vmem:[#allocation101_spill] sm:$0xff]  ;;  %v4321_v1 = vld [vmem:[#allocation94_spill] sm:$0xff]  ;;  %v4322_v35 = vld [vmem:[#allocation15_spill] sm:$0xff] }
 0x209   :  { %v771_v39 = vadd.f32 %v4316_v31, %v627_v37  ;;  %v1164_v13 = vadd.f32 %v3288_v25, %v1044_v52  ;;  %v1830_v50 = vsel %vm1568_vm8, %v1827_v5, %v1829_v59  ;;  %v317_v0 = vadd.f32 %v4317_v9, %v203_v51  ;;  %v4320_v37 = vld [vmem:[#allocation102_spill] sm:$0xff]  ;;  %v4324_v3 = vld [vmem:[#allocation116_spill] sm:$0xff]  ;;  %v4326_v19 = vld [vmem:[#allocation29_spill] sm:$0xff] }
 0x20a   :  { %1833 = vrot.lane.b32.xlu1 %v1825_v34, %s2246_s10  ;;  %v671_v12 = vadd.f32 %v4318_v8, %v539_v6  ;;  %v3584_v53 = vpop.permute.xlu1 %1252  ;;  %v1291_v62 = vpop.permute.xlu0 %1290  ;;  %v1872_v34 = vrot.slane %v3543_v24, 3  ;;  %v3589_v14 = vmul.f32 %v2777_v40, %v4288_v46  ;;  %v914_v45 = vadd.f32 %v4319_v58, %v770_v22  ;;  %v4325_v40 = vld [vmem:[#allocation73_spill] sm:$0xff]  ;;  %v4330_v9 = vld [vmem:[#allocation130_spill] sm:$0xff] }
 0x20b   :  { %v915_v42 = vadd.f32 %v4320_v37, %v771_v39  ;;  %v1045_v25 = vadd.f32 %v3254_v27, %v912_v48  ;;  %v3594_v5 = vadd.f32 %v1291_v62, %v1164_v13  ;;  %v205_v36 = vadd.f32 %v4322_v35, %v4321_v1  ;;  %v4327_v29 = vld [vmem:[#allocation57_spill] sm:$0xff]  ;;  %v4331_v8 = vld [vmem:[#allocation98_spill] sm:$0xff] }
 0x20c   :  { %v431_v52 = vadd.f32 %v4323_v7, %v317_v0  ;;  %v540_v32 = vadd.f32 %v4324_v3, %v429_v57  ;;  %v1067_v24 = vrot.slane %v3284_v2, 2  ;;  %1839 = vrot.lane.b32.xlu0 %v1830_v50, %s2246_s10  ;;  %v815_v51 = vadd.f32 %v4325_v40, %v671_v12  ;;  %v4328_v13 = vld [vmem:[#allocation109_spill] sm:$0xff]  ;;  %v4332_v12 = vld [vmem:[#allocation16_spill] sm:$0xff]  ;;  %v4337_v7 = vld [vmem:[#allocation30_spill] sm:$0xff] }
 0x20d   :  { %v1165_v38 = vadd.f32 %v3333_v54, %v1045_v25  ;;  %v1871_v27 = vsel %vm1568_vm8, %v1869_v55, %v1870_v15  ;;  %v1861_v48 = vmul.f32 %v2781_v56, %v4288_v46  ;;  %v319_v6 = vadd.f32 %v4326_v19, %v205_v36  ;;  %v4329_v50 = vld [vmem:[#allocation129_spill] sm:$0xff]  ;;  %v4338_v3 = vld [vmem:[#allocation59_spill] sm:$0xff] }
 0x20e   :  { %1837 = vrot.lane.b32.xlu1 %v1828_v26, %s2246_s10  ;;  %v672_v22 = vadd.f32 %v4327_v29, %v540_v32  ;;  %v1293_v57 = vpop.permute.xlu1 %1292  ;;  %v3610_v31 = vpop.permute.xlu0 %1294  ;;  %v1873_v26 = vsel %vm1568_vm8, %v1870_v15, %v1872_v34  ;;  %v3615_v39 = vmul.f32 %v2784_v60, %v4288_v46  ;;  %v959_v54 = vadd.f32 %v4328_v13, %v815_v51  ;;  %v4333_v58 = vld [vmem:[#allocation117_spill] sm:$0xff]  ;;  %v4334_v46 = vld [vmem:[#allocation131_spill] sm:$0xff] }
 0x20f   :  { %v1047_v55 = vadd.f32 %v4329_v50, %v914_v45  ;;  %v1048_v0 = vadd.f32 %v4330_v9, %v915_v42  ;;  %v3620_v56 = vadd.f32 %v1293_v57, %v1165_v38  ;;  %v240_v62 = vadd.f32 %v4332_v12, %v4331_v8  ;;  %v4335_v45 = vld [vmem:[#allocation44_spill] sm:$0xff]  ;;  %v4336_v42 = vld [vmem:[#allocation74_spill] sm:$0xff] }
 0x210   :  { %v542_v37 = vadd.f32 %v4333_v58, %v431_v52  ;;  %1879 = vrot.lane.b32.xlu0 %v1871_v27, %s2246_s10  ;;  %v1874_v60 = vrot.slane %v3589_v14, 3  ;;  %v3630_v15 = vmul.f32 %v2794_v11, %v4334_v46  ;;  %v433_v25 = vadd.f32 %v4335_v45, %v319_v6  ;;  %v4339_v38 = vld [vmem:[#allocation112_spill] sm:$0xff]  ;;  %v4340_v27 = vld [vmem:[#allocation133_spill] sm:$0xff]  ;;  %v4343_v57 = vld [vmem:[#allocation134_spill] sm:$0xff] }
 0x211   :  { %v816_v1 = vadd.f32 %v4336_v42, %v672_v22  ;;  %v1167_v35 = vadd.f32 %v3364_v20, %v1047_v55  ;;  %v1168_v36 = vadd.f32 %v3366_v21, %v1048_v0  ;;  %v354_v52 = vadd.f32 %v4337_v7, %v240_v62  ;;  %v4341_v20 = vld [vmem:[#allocation128_spill] sm:$0xff]  ;;  %v4344_v55 = vld [vmem:[#allocation46_spill] sm:$0xff]  ;;  %v4345_v0 = vld [vmem:[#allocation107_spill] sm:$0xff] }
 0x212   :  { %1841 = vrot.lane.b32.xlu1 %v1829_v59, %s2246_s10  ;;  %v674_v59 = vadd.f32 %v4338_v3, %v542_v37  ;;  %v1297_v32 = vpop.permute.xlu1 %1296  ;;  %v1299_v40 = vpop.permute.xlu0 %1298  ;;  %v1875_v51 = vrot.slane %v1861_v48, 3  ;;  %v1877_v14 = vrot.slane %v3615_v39, 3  ;;  %v1080_v19 = vadd.f32 %v4340_v27, %v959_v54  ;;  %v3653_v48 = vld [vmem:[#allocation2] sm:$0xff]  ;;  %v3657_v54 = vld [vmem:[#allocation2 + $0x10] sm:$0x3f]  ;;  %v4348_v58 = vld [vmem:[#allocation86_spill] sm:$0xff] }
 0x213   :  { %v960_v11 = vadd.f32 %v4339_v38, %v816_v1  ;;  %v3641_v6 = vadd.f32 %v1297_v32, %v1167_v35  ;;  %v3643_v29 = vadd.f32 %v1299_v40, %v1168_v36  ;;  %v4342_v21 = vrot.slane %v4341_v20, 2  ;;  %v4349_v37 = vld [vmem:[#allocation9_spill] sm:$0xff]  ;;  %v4351_v32 = vld [vmem:[#allocation118_spill] sm:$0xff] }
 0x214   :  { %v1069_v13 = vrot.slane %v4343_v57, 2  ;;  %1883 = vrot.lane.b32.xlu0 %v1872_v34, %s2246_s10  ;;  %v1905_v39 = vmul.f32 %v3653_v48, %v4334_v46  ;;  %v1907_v50 = vmul.f32 %v3657_v54, %v4334_v46  ;;  %v468_v9 = vadd.f32 %v4344_v55, %v354_v52  ;;  %v4350_v52 = vld [vmem:[#allocation60_spill] sm:$0xff]  ;;  %v4353_v38 = vld [vmem:[#allocation18_spill] sm:$0xff] }
 0x215   :  { %v1068_v22 = vsel %vm1027_vm7, %v4342_v21, %v1067_v24  ;;  %v4346_v8 = vrot.slane %v4345_v0, 1  ;;  %v1212_v34 = vadd.f32 %v3414_v23, %v1080_v19  ;;  %v164_v45 = vadd.f32 %v4349_v37, %v4348_v58  ;;  %v4352_v23 = vld [vmem:[#allocation100_spill] sm:$0xff]  ;;  %v4357_v55 = vld [vmem:[#allocation78_spill] sm:$0xff] }
 0x216   :  { %1881 = vrot.lane.b32.xlu1 %v1873_v26, %s2246_s10  ;;  %v4347_v26 = vld [vmem:[#allocation76_spill] sm:$0xff]  ;;  %v3670_v42 = vpop.permute.xlu1 %1300  ;;  %v1339_v1 = vpop.permute.xlu0 %1338  ;;  %v1876_v35 = vsel %vm1568_vm8, %v1874_v60, %v1875_v51  ;;  %v1878_v36 = vsel %vm1568_vm8, %v1875_v51, %v1877_v14  ;;  %v1918_v7 = vrot.slane %v3630_v15, 3  ;;  %v1081_v40 = vadd.f32 %v1068_v22, %v960_v11  ;;  %v4355_v51 = vld [vmem:[#allocation111_spill] sm:$0xff]  ;;  %v3690_v0 = vld [vmem:[#allocation2 + $0x18] sm:$0xff] }
 0x217   :  { %v544_v12 = vadd.f32 %v4346_v8, %v433_v25  ;;  %v818_v62 = vadd.f32 %v4347_v26, %v674_v59  ;;  %v3677_v59 = vadd.f32 %v1339_v1, %v1212_v34  ;;  %v243_v27 = vadd.f32 %v4353_v38, %v4352_v23  ;;  %v4358_v8 = vld [vmem:[#allocation33_spill] sm:$0xff]  ;;  %v4359_v34 = vld [vmem:[#allocation63_spill] sm:$0xff]  ;;  %v4360_v37 = vld [vmem:[#allocation122_spill] sm:$0xff] }
 0x218   :  { %v4354_v19 = vrot.slane %v3294_v28, 2  ;;  %1887 = vrot.lane.b32.xlu0 %v1878_v36, %s2246_s10  ;;  %v1917_v60 = vrot.slane %v1905_v39, 3  ;;  %v1920_v15 = vrot.slane %v1907_v50, 3  ;;  %v4356_v21 = vrot.slane %v4355_v51, 1  ;;  %v3698_v50 = vld [vmem:[#allocation2 + $0x20] sm:$0xff]  ;;  %v4363_v38 = vld [vmem:[#allocation49_spill] sm:$0xff] }
 0x219   :  { %v676_v3 = vadd.f32 %v4350_v52, %v544_v12  ;;  %v962_v25 = vadd.f32 %v4351_v32, %v818_v62  ;;  %v1213_v22 = vadd.f32 %v3445_v43, %v1081_v40  ;;  %v1908_v28 = vmul.f32 %v3690_v0, %v4334_v46  ;;  %v3702_v62 = vld [vmem:[#allocation2 + $0x28] sm:$0x3f]  ;;  %v4362_v32 = vld [vmem:[#allocation21_spill] sm:$0xff] }
 0x21a   :  { %v1071_v20 = vsel %vm1027_vm7, %v1069_v13, %v4354_v19  ;;  %1885 = vrot.lane.b32.xlu1 %v1876_v35, %s2246_s10  ;;  %v577_v57 = vadd.f32 %v4356_v21, %v468_v9  ;;  %v357_v13 = vadd.f32 %v4358_v8, %v243_v27  ;;  %v1341_v12 = vpop.permute.xlu1 %1340  ;;  %v3695_v26 = vpop.permute.xlu0 %1342  ;;  %v1919_v39 = vsel %vm1568_vm8, %v1917_v60, %v1918_v7  ;;  %v4361_v52 = vld [vmem:[#allocation80_spill] sm:$0xff]  ;;  %v4364_v19 = vld [vmem:[#allocation83_spill] sm:$0xff] }
 0x21b   :  { %v820_v11 = vadd.f32 %v4357_v55, %v676_v3  ;;  %v1909_v9 = vmul.f32 %v3698_v50, %v4334_v46  ;;  %v3706_v43 = vmul.f32 %v3702_v62, %v4334_v46  ;;  %v1083_v35 = vadd.f32 %v1071_v20, %v962_v25  ;;  %v4365_v51 = vld [vmem:[#allocation36_spill] sm:$0xff] }
 0x21c   :  { %v721_v58 = vadd.f32 %v4359_v34, %v577_v57  ;;  %v3710_v36 = vadd.f32 %v1341_v12, %v1213_v22  ;;  %v95_v3 = vmul.f32 %v3702_v62, %v4361_v52  ;;  %v278_v40 = vadd.f32 %v4362_v32, %v164_v45  ;;  %1927 = vrot.lane.b32.xlu0 %v1919_v39, %s2246_s10 }
 0x21d   :  { %v964_v1 = vadd.f32 %v4360_v37, %v820_v11  ;;  %v1921_v23 = vsel %vm1568_vm8, %v1918_v7, %v1920_v15  ;;  %v1952_v46 = vstv %s3661_s6  ;;  %v471_v27 = vadd.f32 %v4363_v38, %v357_v13  ;;  %v4366_v7 = vld [vmem:[#allocation127_spill] sm:$0xff]  ;;  %v4370_v37 = vld [vmem:[#allocation114_spill] sm:$0xff] }
 0x21e   :  { %1889 = vrot.lane.b32.xlu1 %v1877_v14, %s2246_s10  ;;  %v865_v60 = vadd.f32 %v4364_v19, %v721_v58  ;;  %v1215_v25 = vadd.f32 %v3474_v41, %v1083_v35  ;;  %v1922_v20 = vrot.slane %v1908_v28, 3  ;;  %v392_v21 = vadd.f32 %v4365_v51, %v278_v40  ;;  %v1345_v57 = vpop.permute.xlu1 %1344  ;;  %v1347_v55 = vpop.permute.xlu0 %1346  ;;  %v3724_v14 = vld [vmem:[#allocation2 + $0x8] sm:$0xff]  ;;  %v4368_v28 = vld [vmem:[#allocation81_spill] sm:$0xff] }
 0x21f   :  { %v1923_v11 = vrot.slane %v1909_v9, 3  ;;  %v1925_v45 = vrot.slane %v3706_v43, 3  ;;  %v1954_v22 = vmul.f32 %v3724_v14, %v1952_v46  ;;  %v4367_v13 = vrot.slane %v3298_v10, 2  ;;  %v4369_v43 = vld [vmem:[#allocation10_spill] sm:$0xff] }
 0x220   :  { %v1009_v8 = vadd.f32 %v4366_v7, %v865_v60  ;;  %v3730_v39 = vadd.f32 %v1345_v57, %v1215_v25  ;;  %v3733_v41 = vadd.f32 %v1347_v55, %v3488_v4  ;;  %v106_v34 = vmul.f32 %v3657_v54, %v4368_v28  ;;  %1931 = vrot.lane.b32.xlu0 %v1920_v15, %s2246_s10  ;;  %v4372_v4 = vld [vmem:[#allocation92_spill] sm:$0xff]  ;;  %v4376_v55 = vld [vmem:[#allocation13_spill] sm:$0xff] }
 0x221   :  { %v1085_v12 = vadd.f32 %v4367_v13, %v964_v1  ;;  %v1953_v9 = vmul.f32 %v3653_v48, %v1952_v46  ;;  %v167_v58 = vadd.f32 %v4369_v43, %v95_v3  ;;  %v4371_v35 = vrot.slane %v4370_v37, 1  ;;  %v4374_v3 = vld [vmem:[#allocation66_spill] sm:$0xff]  ;;  %v4380_v43 = vld [vmem:[#allocation39_spill] sm:$0xff] }
 0x222   :  { %1929 = vrot.lane.b32.xlu1 %v1921_v23, %s2246_s10  ;;  %v1955_v52 = vmul.f32 %v3657_v54, %v1952_v46  ;;  %v4373_v32 = vrot.slane %v4372_v4, 1  ;;  %v1349_v38 = vpop.permute.xlu1 %1348  ;;  %v1387_v23 = vpop.permute.xlu0 %1386  ;;  %v1924_v15 = vsel %vm1568_vm8, %v1922_v20, %v1923_v11  ;;  %v1926_v19 = vsel %vm1568_vm8, %v1923_v11, %v1925_v45 }
 0x223   :  { %v580_v10 = vadd.f32 %v4371_v35, %v471_v27  ;;  %v1217_v1 = vadd.f32 %v3509_v16, %v1085_v12  ;;  %v1966_v60 = vrot.slane %v1954_v22, 3  ;;  %v4375_v27 = vrot.slane %v3360_v33, 2  ;;  %v4378_v22 = vld [vmem:[#allocation50_spill] sm:$0xff] }
 0x224   :  { %v505_v40 = vadd.f32 %v4373_v32, %v392_v21  ;;  %v3757_v57 = vadd.f32 %v1387_v23, %v3522_v49  ;;  %v202_v7 = vadd.f32 %v4376_v55, %v106_v34  ;;  %v4377_v21 = vld [vmem:[#allocation24_spill] sm:$0xff]  ;;  %1935 = vrot.lane.b32.xlu0 %v1926_v19, %s2246_s10  ;;  %v1965_v20 = vrot.slane %v1953_v9, 3  ;;  %v4379_v33 = vld [vmem:[#allocation90_spill] sm:$0xff]  ;;  %v4383_v23 = vld [vmem:[#allocation27_spill] sm:$0xff] }
 0x225   :  { %v724_v25 = vadd.f32 %v4374_v3, %v580_v10  ;;  %v1118_v51 = vadd.f32 %v4375_v27, %v1009_v8  ;;  %v3754_v16 = vadd.f32 %v1349_v38, %v1217_v1  ;;  %v281_v13 = vadd.f32 %v4377_v21, %v167_v58  ;;  %v4381_v1 = vld [vmem:[#allocation69_spill] sm:$0xff]  ;;  %v4382_v32 = vld [vmem:[#allocation132_spill] sm:$0xff]  ;;  %v4385_v27 = vld [vmem:[#allocation42_spill] sm:$0xff] }
 0x226   :  { %1933 = vrot.lane.b32.xlu1 %v1924_v15, %s2246_s10  ;;  %v1956_v11 = vmul.f32 %v3690_v0, %v1952_v46  ;;  %v625_v12 = vadd.f32 %v4378_v22, %v505_v40  ;;  %v1957_v49 = vmul.f32 %v3698_v50, %v1952_v46  ;;  %v1389_v34 = vpop.permute.xlu1 %1388  ;;  %v1391_v58 = vpop.permute.xlu0 %1390  ;;  %v1967_v35 = vsel %vm1568_vm8, %v1965_v20, %v1966_v60  ;;  %v4384_v19 = vld [vmem:[#allocation97_spill] sm:$0xff]  ;;  %v4386_v22 = vld [vmem:[#allocation95_spill] sm:$0xff] }
 0x227   :  { %v868_v8 = vadd.f32 %v4379_v33, %v724_v25  ;;  %v1262_v28 = vadd.f32 %v3535_v30, %v1118_v51  ;;  %v395_v37 = vadd.f32 %v4380_v43, %v281_v13  ;;  %v1968_v10 = vrot.slane %v1955_v52, 3 }
 0x228   :  { %v1958_v9 = vmul.f32 %v3702_v62, %v1952_v46  ;;  %v769_v4 = vadd.f32 %v4381_v1, %v625_v12  ;;  %v3774_v38 = vadd.f32 %v1389_v34, %v3549_v47  ;;  %v316_v15 = vadd.f32 %v4383_v23, %v202_v7  ;;  %1975 = vrot.lane.b32.xlu0 %v1967_v35, %s2247_s14 }
 0x229   :  { %v1012_v40 = vadd.f32 %v4382_v32, %v868_v8  ;;  %v3776_v30 = vadd.f32 %v1391_v58, %v1262_v28  ;;  %v1970_v52 = vrot.slane %v1956_v11, 3  ;;  %v1971_v25 = vrot.slane %v1957_v49, 3  ;;  %v4388_v8 = vld [vmem:[#allocation51_spill] sm:$0xff]  ;;  %v4389_v49 = vld [vmem:[#allocation124_spill] sm:$0xff] }
 0x22a   :  { %1937 = vrot.lane.b32.xlu1 %v1925_v45, %s2246_s10  ;;  %v913_v3 = vadd.f32 %v4384_v19, %v769_v4  ;;  %v2000_v46 = vstv %s3745_s22  ;;  %v430_v51 = vadd.f32 %v4385_v27, %v316_v15  ;;  %v1393_v55 = vpop.permute.xlu1 %1392  ;;  %v1395_v21 = vpop.permute.xlu0 %1394  ;;  %v1969_v47 = vsel %vm1568_vm8, %v1966_v60, %v1968_v10  ;;  %s3804_s10 = sld [smem:[#allocation3 + $0x20]]  ;;  %v4393_v4 = vld [vmem:[#allocation72_spill] sm:$0xff]  ;;  %v4395_v19 = vld [vmem:[#allocation58_spill] sm:$0xff] }
 0x22b   :  { %v1973_v13 = vrot.slane %v1958_v9, 3  ;;  %v2002_v20 = vmul.f32 %v3724_v14, %v2000_v46  ;;  %v4387_v7 = vrot.slane %v4386_v22, 1  ;;  %v1121_v45 = vadd.f32 %v1108_v18, %v1012_v40  ;;  %v4394_v40 = vld [vmem:[#allocation135_spill] sm:$0xff] }
 0x22c   :  { %v3791_v33 = vadd.f32 %v1393_v55, %v3567_v44  ;;  %v3794_v11 = vadd.f32 %v1395_v21, %v3569_v61  ;;  %1979 = vrot.lane.b32.xlu0 %v1968_v10, %s2247_s14  ;;  %v2001_v60 = vmul.f32 %v3653_v48, %v2000_v46  ;;  %v4390_v43 = vrot.slane %v4389_v49, 2  ;;  %v4391_v44 = vld [vmem:[#allocation106_spill] sm:$0xff] }
 0x22d   :  { %v508_v12 = vadd.f32 %v4387_v7, %v395_v37  ;;  %v1265_v63 = vadd.f32 %v3584_v53, %v1121_v45  ;;  %v1972_v18 = vsel %vm1568_vm8, %v1970_v52, %v1971_v25  ;;  %v4392_v61 = vrot.slane %v4391_v44, 1  ;;  %v4396_v52 = vld [vmem:[#allocation108_spill] sm:$0xff]  ;;  %v4397_v7 = vld [vmem:[#allocation75_spill] sm:$0xff]  ;;  %v4399_v49 = vld [vmem:[#allocation126_spill] sm:$0xff] }
 0x22e   :  { %1977 = vrot.lane.b32.xlu1 %v1969_v47, %s2247_s14  ;;  %v1046_v37 = vadd.f32 %v4390_v43, %v913_v3  ;;  %v1397_v58 = vpop.permute.xlu1 %1396  ;;  %v1435_v35 = vpop.permute.xlu0 %1434  ;;  %v1974_v10 = vsel %vm1568_vm8, %v1971_v25, %v1973_v13  ;;  %v2014_v9 = vrot.slane %v2002_v20, 3  ;;  %v2003_v1 = vmul.f32 %v3657_v54, %v2000_v46 }
 0x22f   :  { %v628_v28 = vadd.f32 %v4388_v8, %v508_v12  ;;  %v541_v34 = vadd.f32 %v4392_v61, %v430_v51  ;;  %v3812_v15 = vadd.f32 %v1397_v58, %v1265_v63  ;;  %v3815_v53 = vadd.f32 %v1435_v35, %v3594_v5  ;;  %v4401_v58 = vld [vmem:[#allocation136_spill] sm:$0xff] }
 0x230   :  { %v1166_v23 = vadd.f32 %v4394_v40, %v1046_v37  ;;  %1983 = vrot.lane.b32.xlu0 %v1974_v10, %s2247_s14  ;;  %v2013_v51 = vrot.slane %v2001_v60, 3  ;;  %v2016_v47 = vrot.slane %v2003_v1, 3  ;;  %v2004_v20 = vmul.f32 %v3690_v0, %v2000_v46  ;;  %v4398_v60 = vld [vmem:[#allocation113_spill] sm:$0xff] }
 0x231   :  { %v772_v32 = vadd.f32 %v4393_v4, %v628_v28  ;;  %v673_v3 = vadd.f32 %v4395_v19, %v541_v34  ;;  %v2005_v5 = vmul.f32 %v3698_v50, %v2000_v46  ;;  %v2006_v22 = vmul.f32 %v3702_v62, %v2000_v46 }
 0x232   :  { %1981 = vrot.lane.b32.xlu1 %v1972_v18, %s2247_s14  ;;  %v1310_v27 = vadd.f32 %v3610_v31, %v1166_v23  ;;  %v1437_v55 = vpop.permute.xlu1 %1436  ;;  %v1439_v21 = vpop.permute.xlu0 %1438  ;;  %v2015_v31 = vsel %vm1568_vm8, %v2013_v51, %v2014_v9  ;;  %v4400_v43 = vrot.slane %v4399_v49, 2  ;;  %v2048_v63 = vstv %s3804_s10 }
 0x233   :  { %v916_v25 = vadd.f32 %v4396_v52, %v772_v32  ;;  %v817_v12 = vadd.f32 %v4397_v7, %v673_v3  ;;  %v3827_v45 = vadd.f32 %v1437_v55, %v3620_v56  ;;  %v2018_v44 = vrot.slane %v2004_v20, 3 }
 0x234   :  { %v3829_v8 = vadd.f32 %v1439_v21, %v1310_v27  ;;  %2023 = vrot.lane.b32.xlu0 %v2015_v31, %s2247_s14  ;;  %v2019_v61 = vrot.slane %v2005_v5, 3  ;;  %v2021_v56 = vrot.slane %v2006_v22, 3  ;;  %v2050_v34 = vmul.f32 %v3724_v14, %v2048_v63 }
 0x235   :  { %v961_v28 = vadd.f32 %v4398_v60, %v817_v12  ;;  %v1049_v37 = vadd.f32 %v4400_v43, %v916_v25  ;;  %v2017_v1 = vsel %vm1568_vm8, %v2014_v9, %v2016_v47  ;;  %v2049_v40 = vmul.f32 %v3653_v48, %v2048_v63 }
 0x236   :  { %1985 = vrot.lane.b32.xlu1 %v1973_v13, %s2247_s14  ;;  %v1441_v46 = vpop.permute.xlu1 %1440  ;;  %v1443_v18 = vpop.permute.xlu0 %1442  ;;  %v2051_v3 = vmul.f32 %v3657_v54, %v2048_v63  ;;  %v2062_v2 = vrot.slane %v2050_v34, 3  ;;  %v2052_v21 = vmul.f32 %v3690_v0, %v2048_v63  ;;  %v2054_v5 = vmul.f32 %v3702_v62, %v2048_v63 }
 0x237   :  { %v1169_v35 = vadd.f32 %v4401_v58, %v1049_v37  ;;  %v3841_v10 = vadd.f32 %v1441_v46, %v3641_v6  ;;  %v3844_v13 = vadd.f32 %v1443_v18, %v3643_v29  ;;  %v1082_v4 = vadd.f32 %v1067_v24, %v961_v28 }
 0x238   :  { %2027 = vrot.lane.b32.xlu0 %v2016_v47, %s2247_s14  ;;  %v2020_v6 = vsel %vm1568_vm8, %v2018_v44, %v2019_v61  ;;  %v2022_v29 = vsel %vm1568_vm8, %v2019_v61, %v2021_v56  ;;  %v2064_v55 = vrot.slane %v2051_v3, 3  ;;  %v2066_v7 = vrot.slane %v2052_v21, 3 }
 0x239   :  { %v1313_v32 = vadd.f32 %v3670_v42, %v1169_v35  ;;  %v1214_v9 = vadd.f32 %v3447_v17, %v1082_v4  ;;  %v2061_v42 = vrot.slane %v2049_v40, 3  ;;  %v2053_v17 = vmul.f32 %v3698_v50, %v2048_v63 }
 0x23a   :  { %2025 = vrot.lane.b32.xlu1 %v2017_v1, %s2247_s14  ;;  %v1445_v23 = vpop.permute.xlu1 %1444  ;;  %v1483_v19 = vpop.permute.xlu0 %1482  ;;  %v2065_v60 = vsel %vm1568_vm8, %v2062_v2, %v2064_v55  ;;  %v2069_v28 = vrot.slane %v2054_v5, 3  ;;  %v1555_v37 = vstv %s2159_s23 }
 0x23b   :  { %v3857_v52 = vadd.f32 %v1445_v23, %v1313_v32  ;;  %v3860_v25 = vadd.f32 %v1483_v19, %v3677_v59  ;;  %v1358_v24 = vadd.f32 %v3695_v26, %v1214_v9  ;;  %v2063_v20 = vsel %vm1568_vm8, %v2061_v42, %v2062_v2 }
 0x23c   :  { %2031 = vrot.lane.b32.xlu0 %v2022_v29, %s2247_s14  ;;  %v2067_v12 = vrot.slane %v2053_v17, 3  ;;  %v1557_v18 = vmul.f32 %v3724_v14, %v1555_v37  ;;  %v1558_v58 = vmul.f32 %v3657_v54, %v1555_v37  ;;  %v1560_v19 = vmul.f32 %v3698_v50, %v1555_v37 }
 0x23e   :  { %2029 = vrot.lane.b32.xlu1 %v2020_v6, %s2247_s14  ;;  %v1485_v27 = vpop.permute.xlu1 %1484  ;;  %v1487_v51 = vpop.permute.xlu0 %1486  ;;  %v1570_v34 = vrot.slane %v1557_v18, 3  ;;  %v1572_v23 = vrot.slane %v1558_v58, 3  ;;  %v1561_v6 = vmul.f32 %v3702_v62, %v1555_v37 }
 0x23f   :  { %v3868_v47 = vadd.f32 %v1485_v27, %v3710_v36  ;;  %v3870_v59 = vadd.f32 %v1487_v51, %v1358_v24  ;;  %v1592_v24 = vstv %s2160_s24  ;;  %v1575_v27 = vrot.slane %v1560_v19, 3 }
 0x240   :  { %2071 = vrot.lane.b32.xlu0 %v2063_v20, %s2247_s14  ;;  %v1573_v42 = vsel %vm1568_vm8, %v1570_v34, %v1572_v23  ;;  %v1577_v51 = vrot.slane %v1561_v6, 3  ;;  %v1587_v17 = vadd.f32 %v1572_v23, %v3829_v8  ;;  %v1593_v5 = vmul.f32 %v3653_v48, %v1592_v24 }
 0x241   :  { %v1586_v21 = vadd.f32 %v1573_v42, %v3827_v45 }
 0x242   :  { %2033 = vrot.lane.b32.xlu1 %v2021_v56, %s2247_s14  ;;  %v1489_v26 = vpop.permute.xlu1 %1488  ;;  %v1491_v22 = vpop.permute.xlu0 %1490  ;;  %v1556_v56 = vmul.f32 %v3653_v48, %v1555_v37 }
 0x243   :  { %v3877_v31 = vadd.f32 %v1489_v26, %v3730_v39  ;;  %v3880_v36 = vadd.f32 %v1491_v22, %v3733_v41  ;;  %v2068_v39 = vsel %vm1568_vm8, %v2066_v7, %v2067_v12  ;;  %v2070_v41 = vsel %vm1568_vm8, %v2067_v12, %v2069_v28 }
 0x244   :  { %2075 = vrot.lane.b32.xlu0 %v2064_v55, %s2247_s14  ;;  %v1569_v4 = vrot.slane %v1556_v56, 3  ;;  %v1594_v55 = vmul.f32 %v3724_v14, %v1592_v24  ;;  %v1578_v7 = vsel %vm1568_vm8, %v1575_v27, %v1577_v51  ;;  %v1598_v56 = vmul.f32 %v3702_v62, %v1592_v24 }
 0x245   :  { %v1589_v8 = vadd.f32 %v1578_v7, %v3844_v13 }
 0x246   :  { %2073 = vrot.lane.b32.xlu1 %v2065_v60, %s2247_s14  ;;  %v1493_v49 = vpop.permute.xlu1 %1492  ;;  %v1531_v43 = vpop.permute.xlu0 %1530  ;;  %v1606_v12 = vrot.slane %v1594_v55, 3  ;;  %v1595_v60 = vmul.f32 %v3657_v54, %v1592_v24  ;;  %v1613_v19 = vrot.slane %v1598_v56, 3 }
 0x247   :  { %v3886_v63 = vadd.f32 %v1493_v49, %v3754_v16  ;;  %v3889_v46 = vadd.f32 %v1531_v43, %v3757_v57  ;;  %v1605_v43 = vrot.slane %v1593_v5, 3 }
 0x248   :  { %2079 = vrot.lane.b32.xlu0 %v2070_v41, %s2247_s14  ;;  %v1596_v41 = vmul.f32 %v3690_v0, %v1592_v24 }
 0x249   :  { %v1607_v18 = vsel %vm1568_vm8, %v1605_v43, %v1606_v12 }
 0x24a   :  { %2077 = vrot.lane.b32.xlu1 %v2068_v39, %s2247_s14  ;;  %v1533_v44 = vpop.permute.xlu1 %1532  ;;  %v1535_v61 = vpop.permute.xlu0 %1534  ;;  %v1621_v13 = vadd.f32 %v1607_v18, %v3860_v25 }
 0x24b   :  { %v3898_v16 = vadd.f32 %v1533_v44, %v3774_v38  ;;  %v3901_v57 = vadd.f32 %v1535_v61, %v3776_v30  ;;  %v1559_v38 = vmul.f32 %v3690_v0, %v1555_v37  ;;  %v1571_v30 = vsel %vm1568_vm8, %v1569_v4, %v1570_v34 }
 0x24c   :  { %v1585_v29 = vadd.f32 %v1571_v30, %v3815_v53  ;;  %v1608_v44 = vrot.slane %v1595_v60, 3  ;;  %v1597_v61 = vmul.f32 %v3698_v50, %v1592_v24  ;;  %v1610_v4 = vrot.slane %v1596_v41, 3 }
 0x24e   :  { %2081 = vrot.lane.b32.xlu1 %v2069_v28, %s2247_s14  ;;  %v1537_v35 = vpop.permute.xlu1 %1536  ;;  %v1539_v1 = vpop.permute.xlu0 %1538  ;;  %s2161_s14 = sld [smem:[#allocation3 + $0x23]]  ;;  %v1609_v30 = vsel %vm1568_vm8, %v1606_v12, %v1608_v44  ;;  %v1611_v23 = vrot.slane %v1597_v61, 3 }
 0x24f   :  { %v3906_v32 = vadd.f32 %v1537_v35, %v3791_v33  ;;  %v3909_v40 = vadd.f32 %v1539_v1, %v3794_v11  ;;  %v1574_v11 = vrot.slane %v1559_v38, 3 }
 0x250   :  { %v1612_v42 = vsel %vm1568_vm8, %v1610_v4, %v1611_v23 }
 0x251   :  { %v1576_v22 = vsel %vm1568_vm8, %v1574_v11, %v1575_v27  ;;  %v1614_v27 = vsel %vm1568_vm8, %v1611_v23, %v1613_v19 }
 0x252   :  { %v1541_v3 = vpop.permute.xlu1 %1540  ;;  %v1688_v9 = vpop.permute.xlu0 %1687  ;;  %v1588_v45 = vadd.f32 %v1576_v22, %v3841_v10  ;;  %v1590_v10 = vadd.f32 %v1577_v51, %v3857_v52  ;;  %v1623_v52 = vadd.f32 %v1608_v44, %v3870_v59 }
 0x253   :  { %v3917_v2 = vadd.f32 %v1541_v3, %v3812_v15  ;;  %v3919_v33 = vadd.f32 %v1688_v9, %v1585_v29  ;;  %v1622_v29 = vadd.f32 %v1609_v30, %v3868_v47  ;;  %v1625_v47 = vadd.f32 %v1614_v27, %v3880_v36 }
 0x254   :  { %v1628_v38 = vstv %s2161_s14 }
 0x255   :  { %v1630_v6 = vmul.f32 %v3724_v14, %v1628_v38  ;;  %v1629_v9 = vmul.f32 %v3653_v48, %v1628_v38  ;;  %v1631_v55 = vmul.f32 %v3657_v54, %v1628_v38  ;;  %v1624_v14 = vadd.f32 %v1612_v42, %v3877_v31 }
 0x256   :  { %v1690_v53 = vpop.permute.xlu1 %1689  ;;  %v1692_v20 = vpop.permute.xlu0 %1691  ;;  %v1633_v7 = vmul.f32 %v3698_v50, %v1628_v38  ;;  %v1634_v54 = vmul.f32 %v3702_v62, %v1628_v38  ;;  %v1626_v31 = vadd.f32 %v1613_v19, %v3886_v63 }
 0x257   :  { %v3926_v15 = vadd.f32 %v1690_v53, %v1586_v21  ;;  %v3928_v26 = vadd.f32 %v1692_v20, %v1587_v17  ;;  %v1642_v51 = vrot.slane %v1630_v6, 3  ;;  %v1641_v17 = vrot.slane %v1629_v9, 3 }
 0x258   :  { %v1632_v20 = vmul.f32 %v3690_v0, %v1628_v38  ;;  %v1644_v22 = vrot.slane %v1631_v55, 3  ;;  %v1649_v43 = vrot.slane %v1634_v54, 3 }
 0x259   :  { %v1643_v5 = vsel %vm1568_vm8, %v1641_v17, %v1642_v51 }
 0x25a   :  { %v1694_v28 = vpop.permute.xlu1 %1693  ;;  %v1696_v49 = vpop.permute.xlu0 %1695  ;;  %v1657_v36 = vadd.f32 %v1643_v5, %v3889_v46  ;;  %v1646_v0 = vrot.slane %v1632_v20, 3  ;;  %v1659_v50 = vadd.f32 %v1644_v22, %v3901_v57  ;;  %v1662_v57 = vadd.f32 %v1649_v43, %v3917_v2 }
 0x25b   :  { %v3935_v37 = vadd.f32 %v1694_v28, %v1588_v45  ;;  %v3937_v39 = vadd.f32 %v1696_v49, %v1589_v8  ;;  %v1645_v28 = vsel %vm1568_vm8, %v1642_v51, %v1644_v22  ;;  %v1647_v49 = vrot.slane %v1633_v7, 3 }
 0x25c   :  { %v1658_v41 = vadd.f32 %v1645_v28, %v3898_v16 }
 0x25d   :  { %v1648_v44 = vsel %vm1568_vm8, %v1646_v0, %v1647_v49  ;;  %v1650_v61 = vsel %vm1568_vm8, %v1647_v49, %v1649_v43 }
 0x25e   :  { %v1698_v34 = vpop.permute.xlu1 %1697  ;;  %v1736_v58 = vpop.permute.xlu0 %1735  ;;  %v1660_v56 = vadd.f32 %v1648_v44, %v3906_v32 }
 0x25f   :  { %v3945_v35 = vadd.f32 %v1698_v34, %v1590_v10  ;;  %v3947_v1 = vadd.f32 %v1736_v58, %v1621_v13  ;;  %v1661_v10 = vadd.f32 %v1650_v61, %v3909_v40 }
 0x262   :  { %v1738_v3 = vpop.permute.xlu1 %1737  ;;  %v1740_v25 = vpop.permute.xlu0 %1739 }
 0x263   :  { %v3954_v11 = vadd.f32 %v1738_v3, %v1622_v29  ;;  %v3956_v24 = vadd.f32 %v1740_v25, %v1623_v52 }
 0x266   :  { %v1742_v59 = vpop.permute.xlu1 %1741  ;;  %v1744_v21 = vpop.permute.xlu0 %1743 }
 0x267   :  { %v3963_v53 = vadd.f32 %v1742_v59, %v1624_v14  ;;  %v3965_v48 = vadd.f32 %v1744_v21, %v1625_v47 }
 0x26a   :  { %v1746_v12 = vpop.permute.xlu1 %1745  ;;  %v1784_v60 = vpop.permute.xlu0 %1783 }
 0x26b   :  { %v3973_v45 = vadd.f32 %v1746_v12, %v1626_v31  ;;  %v3975_v8 = vadd.f32 %v1784_v60, %v1657_v36 }
 0x26e   :  { %v1786_v62 = vpop.permute.xlu1 %1785  ;;  %v1788_v18 = vpop.permute.xlu0 %1787 }
 0x26f   :  { %v3980_v63 = vadd.f32 %v1786_v62, %v1658_v41  ;;  %v3982_v46 = vadd.f32 %v1788_v18, %v1659_v50 }
 0x272   :  { %v1790_v13 = vpop.permute.xlu1 %1789  ;;  %v1792_v34 = vpop.permute.xlu0 %1791 }
 0x273   :  { %v3988_v58 = vadd.f32 %v1790_v13, %v1660_v56  ;;  %v3990_v16 = vadd.f32 %v1792_v34, %v1661_v10 }
 0x276   :  { %v1832_v38 = vpop.permute.xlu0 %1831 }
 0x277   :  { %v1849_v47 = vadd.f32 %v1832_v38, %v3919_v33 }
 0x278   :  { %v1794_v4 = vpop.permute.xlu1 %1793 }
 0x279   :  { %v3993_v30 = vadd.f32 %v1794_v4, %v1662_v57 }
 0x27a   :  { %v1836_v19 = vpop.permute.xlu0 %1835 }
 0x27b   :  { %v1851_v5 = vadd.f32 %v1836_v19, %v3928_v26 }
 0x27c   :  { %v1834_v23 = vpop.permute.xlu1 %1833 }
 0x27d   :  { %v1850_v20 = vadd.f32 %v1834_v23, %v3926_v15 }
 0x27e   :  { %v1840_v29 = vpop.permute.xlu0 %1839 }
 0x27f   :  { %v1853_v36 = vadd.f32 %v1840_v29, %v3937_v39 }
 0x280   :  { %v1838_v6 = vpop.permute.xlu1 %1837 }
 0x281   :  { %v1852_v33 = vadd.f32 %v1838_v6, %v3935_v37 }
 0x282   :  { %v1880_v32 = vpop.permute.xlu0 %1879 }
 0x283   :  { %v1897_v37 = vadd.f32 %v1880_v32, %v3947_v1 }
 0x284   :  { %v1842_v52 = vpop.permute.xlu1 %1841 }
 0x285   :  { %v1854_v28 = vadd.f32 %v1842_v52, %v3945_v35 }
 0x286   :  { %v1884_v40 = vpop.permute.xlu0 %1883 }
 0x287   :  { %v1899_v35 = vadd.f32 %v1884_v40, %v3956_v24 }
 0x288   :  { %v1882_v3 = vpop.permute.xlu1 %1881 }
 0x289   :  { %v1898_v41 = vadd.f32 %v1882_v3, %v3954_v11 }
 0x28a   :  { %v1888_v9 = vpop.permute.xlu0 %1887 }
 0x28b   :  { %v1901_v11 = vadd.f32 %v1888_v9, %v3965_v48 }
 0x28c   :  { %v1886_v25 = vpop.permute.xlu1 %1885 }
 0x28d   :  { %v1900_v44 = vadd.f32 %v1886_v25, %v3963_v53 }
 0x28e   :  { %v1928_v27 = vpop.permute.xlu0 %1927 }
 0x28f   :  { %v1945_v53 = vadd.f32 %v1928_v27, %v3975_v8 }
 0x290   :  { %v1890_v42 = vpop.permute.xlu1 %1889 }
 0x291   :  { %v1902_v13 = vadd.f32 %v1890_v42, %v3973_v45 }
 0x292   :  { %v1932_v55 = vpop.permute.xlu0 %1931 }
 0x293   :  { %v1947_v45 = vadd.f32 %v1932_v55, %v3982_v46 }
 0x294   :  { %v1930_v51 = vpop.permute.xlu1 %1929 }
 0x295   :  { %v1946_v38 = vadd.f32 %v1930_v51, %v3980_v63 }
 0x296   :  { %v3997_v2 = vpop.permute.xlu0 %1935 }
 0x297   :  { %v1949_v63 = vadd.f32 %v3997_v2, %v3990_v16 }
 0x298   :  { %v3995_v14 = vpop.permute.xlu1 %1933 }
 0x299   :  { %v1948_v29 = vadd.f32 %v3995_v14, %v3988_v58 }
 0x29a   :  { %v1976_v21 = vpop.permute.xlu0 %1975 }
 0x29b   :  { %v1993_v17 = vadd.f32 %v1976_v21, %v1849_v47 }
 0x29c   :  { %v4000_v59 = vpop.permute.xlu1 %1937 }
 0x29d   :  { %2096 = vst.msk [vmem:[%s4096_s2] sm:$0xff] %vm2095_vm9, %v1993_v17  ;;  %v1950_v58 = vadd.f32 %v4000_v59, %v3993_v30 }
 0x29e   :  { %v1980_v7 = vpop.permute.xlu0 %1979 }
 0x29f   :  { %v1995_v31 = vadd.f32 %v1980_v7, %v1851_v5 }
 0x2a0   :  { %v1978_v22 = vpop.permute.xlu1 %1977 }
 0x2a1   :  { %v1994_v54 = vadd.f32 %v1978_v22, %v1850_v20  ;;  %2099 = vst.msk [vmem:[%s4096_s2 + $0x10] sm:$0x7] %vm2098_vm10, %v1995_v31 }
 0x2a2   :  { %v1984_v26 = vpop.permute.xlu0 %1983 }
 0x2a3   :  { %2097 = vst.msk [vmem:[%s4096_s2 + $0x8] sm:$0xff] %vm2095_vm9, %v1994_v54  ;;  %v1997_v60 = vadd.f32 %v1984_v26, %v1853_v36 }
 0x2a4   :  { %v1982_v15 = vpop.permute.xlu1 %1981 }
 0x2a5   :  { %v1996_v12 = vadd.f32 %v1982_v15, %v1852_v33  ;;  %2101 = vst.msk [vmem:[%s4096_s2 + $0x50] sm:$0xff] %vm2095_vm9, %v1997_v60 }
 0x2a6   :  { %v2024_v0 = vpop.permute.xlu0 %2023 }
 0x2a7   :  { %2100 = vst.msk [vmem:[%s4096_s2 + $0x48] sm:$0xff] %vm2095_vm9, %v1996_v12  ;;  %v2041_v43 = vadd.f32 %v2024_v0, %v1897_v37 }
 0x2a8   :  { %v1986_v39 = vpop.permute.xlu1 %1985 }
 0x2a9   :  { %v1998_v49 = vadd.f32 %v1986_v39, %v1854_v28  ;;  %2170 = vst.msk [vmem:[%s4096_s2 + $0x18] sm:$0xff] %vm2095_vm9, %v2041_v43 }
 0x2aa   :  { %v2028_v50 = vpop.permute.xlu0 %2027 }
 0x2ab   :  { %2102 = vst.msk [vmem:[%s4096_s2 + $0x58] sm:$0x7] %vm2098_vm10, %v1998_v49  ;;  %v2043_v18 = vadd.f32 %v2028_v50, %v1899_v35 }
 0x2ac   :  { %v2026_v1 = vpop.permute.xlu1 %2025 }
 0x2ad   :  { %v2042_v62 = vadd.f32 %v2026_v1, %v1898_v41  ;;  %2172 = vst.msk [vmem:[%s4096_s2 + $0x28] sm:$0x7] %vm2098_vm10, %v2043_v18 }
 0x2ae   :  { %v2032_v61 = vpop.permute.xlu0 %2031 }
 0x2af   :  { %2171 = vst.msk [vmem:[%s4096_s2 + $0x20] sm:$0xff] %vm2095_vm9, %v2042_v62  ;;  %v2045_v10 = vadd.f32 %v2032_v61, %v1901_v11 }
 0x2b0   :  { %v2030_v24 = vpop.permute.xlu1 %2029 }
 0x2b1   :  { %v2044_v56 = vadd.f32 %v2030_v24, %v1900_v44  ;;  %2174 = vst.msk [vmem:[%s4096_s2 + $0x68] sm:$0xff] %vm2095_vm9, %v2045_v10 }
 0x2b2   :  { %v2072_v34 = vpop.permute.xlu0 %2071 }
 0x2b3   :  { %2173 = vst.msk [vmem:[%s4096_s2 + $0x60] sm:$0xff] %vm2095_vm9, %v2044_v56  ;;  %v2089_v4 = vadd.f32 %v2072_v34, %v1945_v53 }
 0x2b4   :  { %v2034_v48 = vpop.permute.xlu1 %2033 }
 0x2b5   :  { %v2046_v57 = vadd.f32 %v2034_v48, %v1902_v13  ;;  %2176 = vst.msk [vmem:[%s4096_s2 + $0x30] sm:$0xff] %vm2095_vm9, %v2089_v4 }
 0x2b6   :  { %v2076_v23 = vpop.permute.xlu0 %2075 }
 0x2b7   :  { %2175 = vst.msk [vmem:[%s4096_s2 + $0x70] sm:$0x7] %vm2098_vm10, %v2046_v57  ;;  %v2091_v6 = vadd.f32 %v2076_v23, %v1947_v45 }
 0x2b8   :  { %v2074_v8 = vpop.permute.xlu1 %2073 }
 0x2b9   :  { %v2090_v19 = vadd.f32 %v2074_v8, %v1946_v38  ;;  %2178 = vst.msk [vmem:[%s4096_s2 + $0x40] sm:$0x7] %vm2098_vm10, %v2091_v6 }
 0x2ba   :  { %v2080_v52 = vpop.permute.xlu0 %2079 }
 0x2bb   :  { %2177 = vst.msk [vmem:[%s4096_s2 + $0x38] sm:$0xff] %vm2095_vm9, %v2090_v19  ;;  %v2093_v3 = vadd.f32 %v2080_v52, %v1949_v63 }
 0x2bc   :  { %v2078_v46 = vpop.permute.xlu1 %2077 }
 0x2bd   :  { %v2092_v32 = vadd.f32 %v2078_v46, %v1948_v29  ;;  %2180 = vst.msk [vmem:[%s4096_s2 + $0x80] sm:$0xff] %vm2095_vm9, %v2093_v3 }
 0x2bf   :  { %2179 = vst.msk [vmem:[%s4096_s2 + $0x78] sm:$0xff] %vm2095_vm9, %v2092_v32 }
 0x2c0   :  { %v2082_v16 = vpop.permute.xlu1 %2081 }
 0x2c1   :  { %v2094_v40 = vadd.f32 %v2082_v16, %v1950_v58 }
 0x2c3   :  { %2181 = vst.msk [vmem:[%s4096_s2 + $0x88] sm:$0x7] %vm2098_vm10, %v2094_v40 }
 0x2c4   :  { %2121 = vsyncpa [#allocation4], 1 }
 0x2c5   :  { %2122 = vsyncpa [#allocation5], 1 }

</bundles_post_ra>
